<compile_context>
chip_gen: v7x
topology: tpu7x:2x2x1
jax: 0.10.0
libtpu: 0.0.40
codegen_flags: <defaults>
</compile_context>

<pallas_src>
import functools

import jax
import jax.numpy as jnp
from jax import lax
from jax.experimental import pallas as pl
from jax.experimental.pallas import tpu as pltpu


def _attention_img_kernel(x_ref, wqkv_ref, wout_ref, bout_ref, o_ref,
                          *, heads, dim_head, scale, compute_dtype):
    # x_ref : [Bn, b, dim] block (Bn instances per grid step); weights resident.
    bn, b, dim = x_ref.shape
    inner_dim = heads * dim_head
    m = bn * b

    # ---- batched qkv projection: M = Bn*b rows on the MXU ------------------
    x_flat = x_ref[...].reshape(m, dim).astype(compute_dtype)            # [M, dim]
    w_qkv = wqkv_ref[...].astype(compute_dtype)                          # [dim, 3*inner]
    qkv = jnp.dot(x_flat, w_qkv,
                  preferred_element_type=jnp.float32)                    # [M, 3*inner] f32
    qkv = qkv.reshape(bn, b, 3 * inner_dim).astype(compute_dtype)        # [Bn, b, 3*inner]

    # ---- per-head attention, batched over instances via dot_general --------
    head_outs = []
    for h in range(heads):                                               # unrolled (small)
        lo = h * dim_head
        hi = lo + dim_head
        q_h = qkv[:, :, lo:hi]                                           # [Bn, b, d]
        k_h = qkv[:, :, inner_dim + lo:inner_dim + hi]                   # [Bn, b, d]
        v_h = qkv[:, :, 2 * inner_dim + lo:2 * inner_dim + hi]           # [Bn, b, d]

        # dots[i] = (q_h[i] @ k_h[i]^T) * scale  (contract feature dim, batch Bn)
        dots = lax.dot_general(
            q_h, k_h, (((2,), (2,)), ((0,), (0,))),
            preferred_element_type=jnp.float32) * scale                  # [Bn, b, b] f32

        # Numerically-stable softmax; all elementwise math in f32.
        mx = jnp.max(dots, axis=-1, keepdims=True)
        e = jnp.exp(dots - mx)
        attn = e / jnp.sum(e, axis=-1, keepdims=True)                    # [Bn, b, b] f32

        out_h = lax.dot_general(
            attn.astype(compute_dtype), v_h,
            (((2,), (1,)), ((0,), (0,))),
            preferred_element_type=jnp.float32)                          # [Bn, b, d] f32
        head_outs.append(out_h)

    # ---- fused output projection: one K = inner_dim matmul + one bias add --
    out_cat = jnp.concatenate(head_outs, axis=-1)                        # [Bn, b, inner] f32
    out_flat = out_cat.reshape(m, inner_dim).astype(compute_dtype)       # [M, inner]
    w_out = wout_ref[...].astype(compute_dtype)                          # [inner, dim]
    proj = jnp.dot(out_flat, w_out,
                   preferred_element_type=jnp.float32)                   # [M, dim] f32
    proj = proj + bout_ref[...].astype(jnp.float32)                      # bias added once

    o_ref[...] = proj.reshape(bn, b, dim).astype(o_ref.dtype)


def _pick_block_instances(n, target):
    """Largest divisor of n that is <= target (so grid = n // Bn is exact)."""
    bn = max(1, min(target, n))
    while n % bn != 0:
        bn -= 1
    return bn


def attention_img(x, w_qkv, w_out, b_out, *, heads, dim_head,
                  block_instances=32, use_bf16_matmul=True):
    """Attention_img forward.

    x     : [b, dim] (single instance, matching the PyTorch module) or
            [n, b, dim] (batch of independent instances).
    w_qkv : [dim, 3*heads*dim_head]   (pre-transposed: kernel does x @ w_qkv)
    w_out : [heads*dim_head, dim]     (pre-transposed: kernel does out @ w_out)
    b_out : [1, dim]
    block_instances : instances packed per grid step (M = Bn*b MXU rows).
    """
    squeeze = (x.ndim == 2)
    if squeeze:
        x = x[None]
    n, b, dim = x.shape
    scale = dim_head ** (-0.5)

    bn = _pick_block_instances(n, block_instances)
    grid_n = n // bn

    compute_dtype = (jnp.bfloat16
                     if (use_bf16_matmul and x.dtype == jnp.float32)
                     else x.dtype)

    kernel = functools.partial(_attention_img_kernel,
                               heads=heads, dim_head=dim_head, scale=scale,
                               compute_dtype=compute_dtype)

    out = pl.pallas_call(
        kernel,
        out_shape=jax.ShapeDtypeStruct((n, b, dim), x.dtype),
        grid=(grid_n,),
        in_specs=[
            pl.BlockSpec((bn, b, dim), lambda i: (i, 0, 0)),   # Bn instances / step
            pl.BlockSpec(w_qkv.shape, lambda i: (0, 0)),       # resident weights
            pl.BlockSpec(w_out.shape, lambda i: (0, 0)),
            pl.BlockSpec(b_out.shape, lambda i: (0, 0)),
        ],
        out_specs=pl.BlockSpec((bn, b, dim), lambda i: (i, 0, 0)),
        compiler_params=pltpu.CompilerParams(
            dimension_semantics=("parallel",)),                # megacore / v7x 2-TC
    )(x, w_qkv, w_out, b_out)

    return out[0] if squeeze else out


def attention_img_reference(x, w_qkv, w_out, b_out, *, heads, dim_head):
    """Pure-JAX reference mirroring the PyTorch forward (single instance)."""
    b, dim = x.shape
    inner_dim = heads * dim_head
    scale = dim_head ** (-0.5)

    qkv = x @ w_qkv                                            # [b, 3*inner]
    q, k, v = jnp.split(qkv, 3, axis=-1)
    to_heads = lambda t: jnp.transpose(t.reshape(b, heads, dim_head), (1, 0, 2))
    q, k, v = to_heads(q), to_heads(k), to_heads(v)
    dots = jnp.einsum('hid,hjd->hij', q, k) * scale
    attn = jax.nn.softmax(dots, axis=-1)
    out = jnp.einsum('hij,hjd->hid', attn, v)
    out = jnp.transpose(out, (1, 0, 2)).reshape(b, inner_dim)
    return out @ w_out + b_out


if __name__ == "__main__":
    # Small, lane-friendly shapes consistent with the forward: x is [b, dim].
    n_inst = 8          # independent instances
    blk = 4             # instances per grid step -> grid length 2 (even, >= 2)
    b = 8               # tokens per instance (sublane-aligned)
    dim = 128           # feature dim (lane-dense output)
    heads = 4
    dim_head = 32
    inner_dim = heads * dim_head

    key = jax.random.PRNGKey(0)
    k_x, k_qkv, k_out_w, k_out_b = jax.random.split(key, 4)

    x = jax.random.normal(k_x, (n_inst, b, dim), dtype=jnp.float32)

    # Synthetic parameters (PyTorch stores Linear weights as [out, in]; these
    # are pre-transposed so the kernel computes x @ W).
    w_qkv = jax.random.normal(k_qkv, (dim, 3 * inner_dim), dtype=jnp.float32) * 0.05
    w_out = jax.random.normal(k_out_w, (inner_dim, dim), dtype=jnp.float32) * 0.05
    b_out = jax.random.normal(k_out_b, (1, dim), dtype=jnp.float32) * 0.05

    out = attention_img(x, w_qkv, w_out, b_out, heads=heads, dim_head=dim_head,
                        block_instances=blk)
    out = jax.block_until_ready(out)
    assert out.shape == (n_inst, b, dim)

    ref = jax.vmap(
        lambda xi: attention_img_reference(xi, w_qkv, w_out, b_out,
                                           heads=heads, dim_head=dim_head))(x)
    # Tolerance accounts for bf16 MXU operands (f32 accumulation).
    assert jnp.allclose(out, ref, atol=2e-2, rtol=2e-2), "mismatch vs reference"

    # Single-instance path (matches the PyTorch module signature exactly).
    out1 = attention_img(x[0], w_qkv, w_out, b_out, heads=heads, dim_head=dim_head)
    out1 = jax.block_until_ready(out1)
    assert jnp.allclose(out1, ref[0], atol=2e-2, rtol=2e-2)

    print("KERNEL_OK")
</pallas_src>

<mosaic_0001>
module attributes {stable_mosaic.version = 11 : i64} {
  func.func @_attention_img_kernel(%arg0: i32, %arg1: memref<4x8x128xf32, #tpu.memory_space<vmem>>, %arg2: memref<128x384xf32, #tpu.memory_space<vmem>>, %arg3: memref<128x128xf32, #tpu.memory_space<vmem>>, %arg4: memref<1x128xf32, #tpu.memory_space<vmem>>, %arg5: memref<4x8x128xf32, #tpu.memory_space<vmem>>) attributes {dimension_semantics = [#tpu.dimension_semantics<parallel>], iteration_bounds = array<i64: 2>, scalar_prefetch = 0 : i64, scratch_operands = 0 : i64, tpu.core_type = #tpu.core_type<tc>, window_params = [{transform_indices = @transform_0, window_bounds = array<i64: 4, 8, 128>}, {pipeline_mode = #tpu.pipeline_mode<synchronous>, transform_indices = @transform_1, window_bounds = array<i64: 128, 384>}, {pipeline_mode = #tpu.pipeline_mode<synchronous>, transform_indices = @transform_2, window_bounds = array<i64: 128, 128>}, {pipeline_mode = #tpu.pipeline_mode<synchronous>, transform_indices = @transform_3, window_bounds = array<i64: 1, 128>}, {transform_indices = @transform_4, window_bounds = array<i64: 4, 8, 128>}]} {
    %c0 = arith.constant 0 : index
    %c0_0 = arith.constant 0 : index
    %c0_1 = arith.constant 0 : index
    %0 = vector.load %arg1[%c0, %c0_0, %c0_1] : memref<4x8x128xf32, #tpu.memory_space<vmem>>, vector<4x8x128xf32>
    %1 = vector.shape_cast %0 : vector<4x8x128xf32> to vector<32x128xf32>
    %2 = arith.truncf %1 : vector<32x128xf32> to vector<32x128xbf16>
    %c0_2 = arith.constant 0 : index
    %c0_3 = arith.constant 0 : index
    %3 = vector.load %arg2[%c0_2, %c0_3] : memref<128x384xf32, #tpu.memory_space<vmem>>, vector<128x384xf32>
    %4 = arith.truncf %3 : vector<128x384xf32> to vector<128x384xbf16>
    %cst = arith.constant dense<0.000000e+00> : vector<32x384xf32>
    %5 = tpu.matmul %2, %4, %cst {dimension_numbers = #tpu.dot_dimension_numbers<[1], [0], [0], [1], [0, 0, 1, 1], [], []>} : vector<32x128xbf16>, vector<128x384xbf16>, vector<32x384xf32> -> vector<32x384xf32>
    %6 = vector.shape_cast %5 : vector<32x384xf32> to vector<4x8x384xf32>
    %7 = arith.truncf %6 : vector<4x8x384xf32> to vector<4x8x384xbf16>
    %8 = vector.extract_strided_slice %7 {offsets = [0, 0, 0], sizes = [4, 8, 32], strides = [1, 1, 1]} : vector<4x8x384xbf16> to vector<4x8x32xbf16>
    %9 = vector.extract_strided_slice %7 {offsets = [0, 0, 128], sizes = [4, 8, 32], strides = [1, 1, 1]} : vector<4x8x384xbf16> to vector<4x8x32xbf16>
    %10 = vector.extract_strided_slice %7 {offsets = [0, 0, 256], sizes = [4, 8, 32], strides = [1, 1, 1]} : vector<4x8x384xbf16> to vector<4x8x32xbf16>
    %cst_4 = arith.constant dense<0.000000e+00> : vector<4x8x8xf32>
    %11 = tpu.matmul %8, %9, %cst_4 {dimension_numbers = #tpu.dot_dimension_numbers<[2], [2], [1], [1], [0, 0, 0, 1, 1, 1], [0], [0]>} : vector<4x8x32xbf16>, vector<4x8x32xbf16>, vector<4x8x8xf32> -> vector<4x8x8xf32>
    %cst_5 = arith.constant 0.176776692 : f32
    %12 = vector.broadcast %cst_5 : f32 to vector<4x8x8xf32>
    %13 = arith.mulf %11, %12 : vector<4x8x8xf32>
    %cst_6 = arith.constant dense<0xFF800000> : vector<4x8xf32>
    %14 = vector.multi_reduction <maximumf>, %13, %cst_6 [2] : vector<4x8x8xf32> to vector<4x8xf32>
    %15 = vector.shape_cast %14 : vector<4x8xf32> to vector<4x8x1xf32>
    %16 = vector.broadcast %15 : vector<4x8x1xf32> to vector<4x8x8xf32>
    %17 = arith.subf %13, %16 : vector<4x8x8xf32>
    %18 = math.exp %17 : vector<4x8x8xf32>
    %cst_7 = arith.constant dense<0.000000e+00> : vector<4x8xf32>
    %19 = vector.multi_reduction <add>, %18, %cst_7 [2] : vector<4x8x8xf32> to vector<4x8xf32>
    %20 = vector.shape_cast %19 : vector<4x8xf32> to vector<4x8x1xf32>
    %21 = vector.broadcast %20 : vector<4x8x1xf32> to vector<4x8x8xf32>
    %22 = arith.divf %18, %21 : vector<4x8x8xf32>
    %23 = arith.truncf %22 : vector<4x8x8xf32> to vector<4x8x8xbf16>
    %cst_8 = arith.constant dense<0.000000e+00> : vector<4x8x32xf32>
    %24 = tpu.matmul %23, %10, %cst_8 {dimension_numbers = #tpu.dot_dimension_numbers<[2], [1], [1], [2], [0, 0, 0, 1, 1, 2], [0], [0]>} : vector<4x8x8xbf16>, vector<4x8x32xbf16>, vector<4x8x32xf32> -> vector<4x8x32xf32>
    %25 = vector.extract_strided_slice %7 {offsets = [0, 0, 32], sizes = [4, 8, 32], strides = [1, 1, 1]} : vector<4x8x384xbf16> to vector<4x8x32xbf16>
    %26 = vector.extract_strided_slice %7 {offsets = [0, 0, 160], sizes = [4, 8, 32], strides = [1, 1, 1]} : vector<4x8x384xbf16> to vector<4x8x32xbf16>
    %27 = vector.extract_strided_slice %7 {offsets = [0, 0, 288], sizes = [4, 8, 32], strides = [1, 1, 1]} : vector<4x8x384xbf16> to vector<4x8x32xbf16>
    %cst_9 = arith.constant dense<0.000000e+00> : vector<4x8x8xf32>
    %28 = tpu.matmul %25, %26, %cst_9 {dimension_numbers = #tpu.dot_dimension_numbers<[2], [2], [1], [1], [0, 0, 0, 1, 1, 1], [0], [0]>} : vector<4x8x32xbf16>, vector<4x8x32xbf16>, vector<4x8x8xf32> -> vector<4x8x8xf32>
    %cst_10 = arith.constant 0.176776692 : f32
    %29 = vector.broadcast %cst_10 : f32 to vector<4x8x8xf32>
    %30 = arith.mulf %28, %29 : vector<4x8x8xf32>
    %cst_11 = arith.constant dense<0xFF800000> : vector<4x8xf32>
    %31 = vector.multi_reduction <maximumf>, %30, %cst_11 [2] : vector<4x8x8xf32> to vector<4x8xf32>
    %32 = vector.shape_cast %31 : vector<4x8xf32> to vector<4x8x1xf32>
    %33 = vector.broadcast %32 : vector<4x8x1xf32> to vector<4x8x8xf32>
    %34 = arith.subf %30, %33 : vector<4x8x8xf32>
    %35 = math.exp %34 : vector<4x8x8xf32>
    %cst_12 = arith.constant dense<0.000000e+00> : vector<4x8xf32>
    %36 = vector.multi_reduction <add>, %35, %cst_12 [2] : vector<4x8x8xf32> to vector<4x8xf32>
    %37 = vector.shape_cast %36 : vector<4x8xf32> to vector<4x8x1xf32>
    %38 = vector.broadcast %37 : vector<4x8x1xf32> to vector<4x8x8xf32>
    %39 = arith.divf %35, %38 : vector<4x8x8xf32>
    %40 = arith.truncf %39 : vector<4x8x8xf32> to vector<4x8x8xbf16>
    %cst_13 = arith.constant dense<0.000000e+00> : vector<4x8x32xf32>
    %41 = tpu.matmul %40, %27, %cst_13 {dimension_numbers = #tpu.dot_dimension_numbers<[2], [1], [1], [2], [0, 0, 0, 1, 1, 2], [0], [0]>} : vector<4x8x8xbf16>, vector<4x8x32xbf16>, vector<4x8x32xf32> -> vector<4x8x32xf32>
    %42 = vector.extract_strided_slice %7 {offsets = [0, 0, 64], sizes = [4, 8, 32], strides = [1, 1, 1]} : vector<4x8x384xbf16> to vector<4x8x32xbf16>
    %43 = vector.extract_strided_slice %7 {offsets = [0, 0, 192], sizes = [4, 8, 32], strides = [1, 1, 1]} : vector<4x8x384xbf16> to vector<4x8x32xbf16>
    %44 = vector.extract_strided_slice %7 {offsets = [0, 0, 320], sizes = [4, 8, 32], strides = [1, 1, 1]} : vector<4x8x384xbf16> to vector<4x8x32xbf16>
    %cst_14 = arith.constant dense<0.000000e+00> : vector<4x8x8xf32>
    %45 = tpu.matmul %42, %43, %cst_14 {dimension_numbers = #tpu.dot_dimension_numbers<[2], [2], [1], [1], [0, 0, 0, 1, 1, 1], [0], [0]>} : vector<4x8x32xbf16>, vector<4x8x32xbf16>, vector<4x8x8xf32> -> vector<4x8x8xf32>
    %cst_15 = arith.constant 0.176776692 : f32
    %46 = vector.broadcast %cst_15 : f32 to vector<4x8x8xf32>
    %47 = arith.mulf %45, %46 : vector<4x8x8xf32>
    %cst_16 = arith.constant dense<0xFF800000> : vector<4x8xf32>
    %48 = vector.multi_reduction <maximumf>, %47, %cst_16 [2] : vector<4x8x8xf32> to vector<4x8xf32>
    %49 = vector.shape_cast %48 : vector<4x8xf32> to vector<4x8x1xf32>
    %50 = vector.broadcast %49 : vector<4x8x1xf32> to vector<4x8x8xf32>
    %51 = arith.subf %47, %50 : vector<4x8x8xf32>
    %52 = math.exp %51 : vector<4x8x8xf32>
    %cst_17 = arith.constant dense<0.000000e+00> : vector<4x8xf32>
    %53 = vector.multi_reduction <add>, %52, %cst_17 [2] : vector<4x8x8xf32> to vector<4x8xf32>
    %54 = vector.shape_cast %53 : vector<4x8xf32> to vector<4x8x1xf32>
    %55 = vector.broadcast %54 : vector<4x8x1xf32> to vector<4x8x8xf32>
    %56 = arith.divf %52, %55 : vector<4x8x8xf32>
    %57 = arith.truncf %56 : vector<4x8x8xf32> to vector<4x8x8xbf16>
    %cst_18 = arith.constant dense<0.000000e+00> : vector<4x8x32xf32>
    %58 = tpu.matmul %57, %44, %cst_18 {dimension_numbers = #tpu.dot_dimension_numbers<[2], [1], [1], [2], [0, 0, 0, 1, 1, 2], [0], [0]>} : vector<4x8x8xbf16>, vector<4x8x32xbf16>, vector<4x8x32xf32> -> vector<4x8x32xf32>
    %59 = vector.extract_strided_slice %7 {offsets = [0, 0, 96], sizes = [4, 8, 32], strides = [1, 1, 1]} : vector<4x8x384xbf16> to vector<4x8x32xbf16>
    %60 = vector.extract_strided_slice %7 {offsets = [0, 0, 224], sizes = [4, 8, 32], strides = [1, 1, 1]} : vector<4x8x384xbf16> to vector<4x8x32xbf16>
    %61 = vector.extract_strided_slice %7 {offsets = [0, 0, 352], sizes = [4, 8, 32], strides = [1, 1, 1]} : vector<4x8x384xbf16> to vector<4x8x32xbf16>
    %cst_19 = arith.constant dense<0.000000e+00> : vector<4x8x8xf32>
    %62 = tpu.matmul %59, %60, %cst_19 {dimension_numbers = #tpu.dot_dimension_numbers<[2], [2], [1], [1], [0, 0, 0, 1, 1, 1], [0], [0]>} : vector<4x8x32xbf16>, vector<4x8x32xbf16>, vector<4x8x8xf32> -> vector<4x8x8xf32>
    %cst_20 = arith.constant 0.176776692 : f32
    %63 = vector.broadcast %cst_20 : f32 to vector<4x8x8xf32>
    %64 = arith.mulf %62, %63 : vector<4x8x8xf32>
    %cst_21 = arith.constant dense<0xFF800000> : vector<4x8xf32>
    %65 = vector.multi_reduction <maximumf>, %64, %cst_21 [2] : vector<4x8x8xf32> to vector<4x8xf32>
    %66 = vector.shape_cast %65 : vector<4x8xf32> to vector<4x8x1xf32>
    %67 = vector.broadcast %66 : vector<4x8x1xf32> to vector<4x8x8xf32>
    %68 = arith.subf %64, %67 : vector<4x8x8xf32>
    %69 = math.exp %68 : vector<4x8x8xf32>
    %cst_22 = arith.constant dense<0.000000e+00> : vector<4x8xf32>
    %70 = vector.multi_reduction <add>, %69, %cst_22 [2] : vector<4x8x8xf32> to vector<4x8xf32>
    %71 = vector.shape_cast %70 : vector<4x8xf32> to vector<4x8x1xf32>
    %72 = vector.broadcast %71 : vector<4x8x1xf32> to vector<4x8x8xf32>
    %73 = arith.divf %69, %72 : vector<4x8x8xf32>
    %74 = arith.truncf %73 : vector<4x8x8xf32> to vector<4x8x8xbf16>
    %cst_23 = arith.constant dense<0.000000e+00> : vector<4x8x32xf32>
    %75 = tpu.matmul %74, %61, %cst_23 {dimension_numbers = #tpu.dot_dimension_numbers<[2], [1], [1], [2], [0, 0, 0, 1, 1, 2], [0], [0]>} : vector<4x8x8xbf16>, vector<4x8x32xbf16>, vector<4x8x32xf32> -> vector<4x8x32xf32>
    %76 = tpu.concatenate %24, %41, %58, %75 in 2 : vector<4x8x32xf32>, vector<4x8x32xf32>, vector<4x8x32xf32>, vector<4x8x32xf32> -> vector<4x8x128xf32>
    %77 = vector.shape_cast %76 : vector<4x8x128xf32> to vector<32x128xf32>
    %78 = arith.truncf %77 : vector<32x128xf32> to vector<32x128xbf16>
    %c0_24 = arith.constant 0 : index
    %c0_25 = arith.constant 0 : index
    %79 = vector.load %arg3[%c0_24, %c0_25] : memref<128x128xf32, #tpu.memory_space<vmem>>, vector<128x128xf32>
    %80 = arith.truncf %79 : vector<128x128xf32> to vector<128x128xbf16>
    %cst_26 = arith.constant dense<0.000000e+00> : vector<32x128xf32>
    %81 = tpu.matmul %78, %80, %cst_26 {dimension_numbers = #tpu.dot_dimension_numbers<[1], [0], [0], [1], [0, 0, 1, 1], [], []>} : vector<32x128xbf16>, vector<128x128xbf16>, vector<32x128xf32> -> vector<32x128xf32>
    %c0_27 = arith.constant 0 : index
    %c0_28 = arith.constant 0 : index
    %82 = vector.load %arg4[%c0_27, %c0_28] : memref<1x128xf32, #tpu.memory_space<vmem>>, vector<1x128xf32>
    %83 = vector.broadcast %82 : vector<1x128xf32> to vector<32x128xf32>
    %84 = arith.addf %81, %83 : vector<32x128xf32>
    %85 = vector.shape_cast %84 : vector<32x128xf32> to vector<4x8x128xf32>
    %c0_29 = arith.constant 0 : index
    %c0_30 = arith.constant 0 : index
    %c0_31 = arith.constant 0 : index
    %86 = vector.load %arg5[%c0_29, %c0_30, %c0_31] : memref<4x8x128xf32, #tpu.memory_space<vmem>>, vector<4x8x128xf32>
    tpu.vector_store %arg5[%c0_29, %c0_30, %c0_31], %85 {strides = array<i32>} : memref<4x8x128xf32, #tpu.memory_space<vmem>>, vector<4x8x128xf32>,
    return
  }
  func.func @transform_0(%arg0: i32) -> (i32, i32, i32) {
    %c0_i32 = arith.constant 0 : i32
    %c0_i32_0 = arith.constant 0 : i32
    %c0_i32_1 = arith.constant 0 : i32
    return %arg0, %c0_i32, %c0_i32_0 : i32, i32, i32
  }
  func.func @transform_1(%arg0: i32) -> (i32, i32) {
    %c0_i32 = arith.constant 0 : i32
    %c0_i32_0 = arith.constant 0 : i32
    %c0_i32_1 = arith.constant 0 : i32
    return %c0_i32, %c0_i32_0 : i32, i32
  }
  func.func @transform_2(%arg0: i32) -> (i32, i32) {
    %c0_i32 = arith.constant 0 : i32
    %c0_i32_0 = arith.constant 0 : i32
    %c0_i32_1 = arith.constant 0 : i32
    return %c0_i32, %c0_i32_0 : i32, i32
  }
  func.func @transform_3(%arg0: i32) -> (i32, i32) {
    %c0_i32 = arith.constant 0 : i32
    %c0_i32_0 = arith.constant 0 : i32
    %c0_i32_1 = arith.constant 0 : i32
    return %c0_i32, %c0_i32_0 : i32, i32
  }
  func.func @transform_4(%arg0: i32) -> (i32, i32, i32) {
    %c0_i32 = arith.constant 0 : i32
    %c0_i32_0 = arith.constant 0 : i32
    %c0_i32_1 = arith.constant 0 : i32
    return %arg0, %c0_i32, %c0_i32_0 : i32, i32, i32
  }
}

</mosaic_0001>

<bundles_post_ra>
// kernel: tpu_custom_call.1
= control target key start
LH: loop header
LB: loop body
LE: loop exit
PB: predicated region body
PF: predicated region fallthrough
CT: control target
= control target key end

     0   :  { %9 = vsyncpa [#allocation3], 0  ;;  %s3820_s0 = inlined_call_operand.hbm [shape: f32[8,8,128], index: 0, kind: input, shape index: {}]   ;;  %s3821_s1 = inlined_call_operand.hbm [shape: f32[128,384], index: 1, kind: input, shape index: {}]   ;;  %s3822_s2 = inlined_call_operand.hbm [shape: f32[128,128], index: 2, kind: input, shape index: {}]   ;;  %s3823_s3 = inlined_call_operand.vmem [shape: f32[1,128], index: 3, kind: input, shape index: {}]   ;;  %s3824_s4 = inlined_call_operand.hbm [shape: f32[8,8,128], index: 4, kind: output, shape index: {}]  }
   0x1   :  { %11 = vsyncpa [#allocation3 + $0x1], 0 }
   0x2   :  { %12 = vsyncpa [#allocation6], 0 }
   0x3   :  { %13 = vsyncpa [#allocation4], 0 }
   0x4   :  { %15 = vsyncpa [#allocation4 + $0x1], 0  ;;  %s3202_s15 = smov 0   ;;  %s3204_s16 = smov 0  }
   0x5   :  { %s3206_s17 = smov 0   ;;  %s3208_s18 = smov 0  }
   0x6 LB: > { %s3223_s19 = sadd.s32 4294967295, %s3159_s18   ;;  %s2461_s20 = sadd.s32 4294967294, %s3159_s18   ;;  %s3159_s18 = sphi %s3208_s18, %s3844_s18   ;;  %s3155_s17 = sphi %s3206_s17, %s3843_s17   ;;  %s3151_s16 = sphi %s3204_s16, %s3842_s16   ;;  %s3147_s15 = sphi %s3202_s15, %s3841_s15  }
   0x7   : > { %p41_p0 = scmp.ne.s32.totalorder %s3151_s16, %s3147_s15  ;;  %p3825_p1 = scmp.eq.s32.totalorder %s3223_s19, 0 }
   0x8   : > { %p134_p3 = scmp.eq.s32.totalorder %s2461_s20, 1  ;;  %p2462_p5 = scmp.ge.s32.totalorder %s3159_s18, 1 }
   0x9   : > { %p3232_p4 = por %p3825_p1, %p41_p0  ;;  %p141_p7 = scmp.lt.s32.totalorder %s3159_s18, 3 }
   0xa   : > { %p3237_p6 = por %p134_p3, %p41_p0  ;;  %s3161_s24 = smov [#allocation5]  }
   0xb   : > { %s3828_s21 = scalar_select %p3232_p4, 1, 0 }
   0xc   : > { %s3829_s22 = scalar_select %p3237_p6, 1, 0 }
   0xd   : > { %p3242_p8 = pnand %p2462_p5, %p141_p7  ;;  %s153_s25 = sshll.u32 %s3161_s24, 4  ;;  %s3246_s25 = int_to_ptr.vmem [resolvable:$true] %s153_s25 }
   0xe   : > { %s3162_s27 = smov [#allocation7]   ;;  %s3003_s5 = scalar_lea.hbm %s3821_s1, 6144 }
   0xf   : > { %p2842_p9 = pneg %p3242_p8  ;;  %s166_s28 = sshll.u32 %s3162_s27, 4  ;;  %s3257_s28 = int_to_ptr.vmem [resolvable:$true] %s166_s28 }
  0x10   : > { %p3004_p12 = scmp.ne.s32.totalorder %s3821_s1, %s3003_s5  ;;  %p3010_p5 = scmp.lt.u32.totalorder %s3003_s5, %s3821_s1 }
  0x11   : > { %p3253_p11 = pnand %p2842_p9, %p3825_p1 }
  0x13   : > { %p3005_p13 = pneg %p3253_p11 }
  0x15   : > { %p3006_p0 = pnand %p3005_p13, %p3004_p12 }
  0x17   : > { %p3007_p3 = pneg %p3006_p0 }
  0x19   : > { %p3012_p7 = pnand %p3010_p5, %p3007_p3 }
  0x1b   : > { %3015 = shalt.err (!%p3012_p7)
}
  0x1c   : > { %s3016_s10 = scalar_lea.vmem %s3246_s25, 6144  ;;  %p3024_p2 = scmp.lt.s32.totalorder %s3246_s25, %s3246_s25 }
  0x1d   : > { %p3017_p9 = scmp.ne.s32.totalorder %s3246_s25, %s3016_s10  ;;  %p3025_p12 = scmp.lt.s32.totalorder %s3016_s10, %s3016_s10 }
  0x1f   : > { %p3019_p10 = pnand %p3017_p9, %p3005_p13  ;;  %p3026_p0 = por %p3025_p12, %p3024_p2 }
  0x21   : > { %p3020_p1 = pneg %p3019_p10 }
  0x23   : > { %p3027_p6 = pnand %p3026_p0, %p3020_p1 }
  0x25   : > { %3030 = shalt.err (!%p3027_p6)
}
  0x26   : > { %s3163_s11 = smov 384   ;;  %s3164_s12 = smov 24  }
  0x27   : > { %2845 = dma.hbm_to_vmem [thread:$0]  (!%p3253_p11), %s3821_s1, 6144, %s3246_s25, [#allocation6], %s3163_s11, %s3163_s11, %s3164_s12  }
  0x28   : > { %s3031_s27 = scalar_lea.hbm %s3822_s2, 2048 }
  0x29   : > { %p3032_p2 = scmp.ne.s32.totalorder %s3822_s2, %s3031_s27  ;;  %p3038_p10 = scmp.lt.u32.totalorder %s3031_s27, %s3822_s2 }
  0x2b   : > { %p3034_p1 = pnand %p3032_p2, %p3005_p13 }
  0x2d   : > { %p3035_p6 = pneg %p3034_p1 }
  0x2f   : > { %p3040_p3 = pnand %p3038_p10, %p3035_p6 }
  0x31   : > { %3043 = shalt.err (!%p3040_p3)
}
  0x32   : > { %s3044_s25 = scalar_lea.vmem %s3257_s28, 2048  ;;  %p3052_p12 = scmp.lt.s32.totalorder %s3257_s28, %s3257_s28 }
  0x33   : > { %p3045_p5 = scmp.ne.s32.totalorder %s3257_s28, %s3044_s25  ;;  %p3053_p0 = scmp.lt.s32.totalorder %s3044_s25, %s3044_s25 }
  0x35   : > { %p3047_p7 = pnand %p3045_p5, %p3005_p13  ;;  %p3054_p2 = por %p3053_p0, %p3052_p12 }
  0x37   : > { %p3048_p9 = pneg %p3047_p7 }
  0x39   : > { %p3055_p1 = pnand %p3054_p2, %p3048_p9 }
  0x3b   : > { %3058 = shalt.err (!%p3055_p1)
}
  0x3c   : > { %s3165_s7 = smov 128   ;;  %s3166_s8 = smov 8  }
  0x3d   : > { %2848 = dma.hbm_to_vmem [thread:$0]  (!%p3253_p11), %s3822_s2, 2048, %s3257_s28, [#allocation6], %s3165_s7, %s3165_s7, %s3166_s8  }
  0x3e   : > { %s3315_s11 = sadd.s32 1, %s3159_s18   ;;  %s28_s13 = sadd.s32 1, %s3155_s17 }
  0x3f   : > { %s25_s12 = ssub.s32 %s3159_s18, %s3315_s11  ;;  %p35_p6 = scmp.ne.s32.totalorder %s3155_s17, %s3151_s16 }
  0x40   : > { %p26_p13 = scmp.eq.s32.totalorder %s25_s12, 0  ;;  %p36_p10 = scmp.eq.s32.totalorder %s3159_s18, 0 }
  0x41   : > { %p3832_p5 = scmp.eq.s32.totalorder %s3223_s19, 1  ;;  %p2859_p9 = scmp.lt.s32.totalorder %s3159_s18, 2 }
  0x42   : > { %s3324_s14 = scalar_select %p26_p13, %s3155_s17, %s28_s13  }
  0x43   : > { %p37_p3 = por %p36_p10, %p35_p6  ;;  %p3328_p7 = por %p3832_p5, %p35_p6 }
  0x44   : > { %s183_s20 = sand.u32 1, %s3155_s17   ;;  %s2512_s28 = sshll.u32 %s3159_s18, 9 }
  0x45   : > { %s3833_s26 = scalar_select %p3328_p7, 1, 0 }
  0x46   : > { %s2466_s24 = sshll.u32 %s183_s20, 5  ;;  %s3338_s30 = scalar_lea.hbm %s3820_s0, %s2512_s28 }
  0x47   : > { %s187_s5 = scalar_lea.vmem [#allocation2], %s2466_s24  ;;  %p3342_p11 = pnand %p2859_p9, %p37_p3 }
  0x48   : > { %s194_s6 = sshll.u32 %s187_s5, 4  ;;  %s3346_s9 = scalar_lea.sflag [#allocation3], %s183_s20  ;;  %s3340_s6 = int_to_ptr.vmem [resolvable:$true] %s194_s6 }
  0x49   : > { %s3059_s10 = scalar_lea.hbm %s3338_s30, 512  ;;  %p3061_p0 = pneg %p3342_p11 }
  0x4a   : > { %p3060_p12 = scmp.ne.s32.totalorder %s3338_s30, %s3059_s10  ;;  %s3064_s24 = scalar_lea.hbm %s3820_s0, 1024 }
  0x4b   : > { %p3065_p13 = scmp.lt.u32.totalorder %s3338_s30, %s3820_s0  ;;  %p3066_p6 = scmp.lt.u32.totalorder %s3064_s24, %s3059_s10 }
  0x4c   : > { %p3062_p2 = pnand %p3061_p0, %p3060_p12  ;;  %p3068_p3 = scmp.lt.u32.totalorder %s3059_s10, %s3338_s30 }
  0x4d   : > { %p3067_p10 = por %p3066_p6, %p3065_p13 }
  0x4e   : > { %p3063_p1 = pneg %p3062_p2 }
  0x4f   : > { %p3069_p5 = por %p3068_p3, %p3067_p10 }
  0x51   : > { %p3070_p9 = pnand %p3069_p5, %p3063_p1 }
  0x53   : > { %3073 = shalt.err (!%p3070_p9)
}
  0x54   : > { %s3074_s20 = scalar_lea.vmem %s3340_s6, 512  ;;  %s3167_s29 = smov [#allocation2]  }
  0x55   : > { %p3075_p12 = scmp.ne.s32.totalorder %s3340_s6, %s3074_s20  ;;  %s3079_s5 = sshll.u32 %s3167_s29, 4  ;;  %s3080_s5 = int_to_ptr.vmem [resolvable:$false] %s3079_s5 }
  0x56   : > { %s3081_s12 = scalar_lea.vmem %s3080_s5, 1024  ;;  %p3082_p4 = scmp.lt.s32.totalorder %s3340_s6, %s3080_s5 }
  0x57   : > { %p3077_p2 = pnand %p3075_p12, %p3061_p0  ;;  %p3083_p13 = scmp.lt.s32.totalorder %s3081_s12, %s3074_s20 }
  0x59   : > { %p3078_p7 = pneg %p3077_p2  ;;  %p3084_p6 = por %p3083_p13, %p3082_p4 }
  0x5b   : > { %p3085_p10 = pnand %p3084_p6, %p3078_p7 }
  0x5d   : > { %3088 = shalt.err (!%p3085_p10)
}
  0x5e   : > { %2852 = dma.hbm_to_vmem [thread:$0]  (!%p3342_p11), %s3338_s30, 512, %s3340_s6, %s3346_s9, %s3165_s7, %s3165_s7, %s3166_s8  }
  0x5f   : > { %206 = sbr.rel (%p3242_p8) target bundleno = 3303 (0xce7), region = 36  ;;  %s3380_s10 = sand.u32 (!%p3242_p8), 1, %s3151_s16  }
  0x60   : > { %s2470_s13 = sshll.u32 (!%p3242_p8), %s3380_s10, 5  ;;  %s209_s24 = scalar_lea.sflag (!%p3242_p8), [#allocation3], %s3380_s10 }
  0x61   : > { %s3386_s25 = scalar_lea.vmem (!%p3242_p8), [#allocation2], %s2470_s13  ;;  %p3835_p4 = scmp.ne.s32.totalorder (!%p3242_p8), %s3828_s21, 0 }
  0x66   : > { %3134 = dma.done.wait (%p3835_p4), %s209_s24, 512  }
  0x67   : > { %3136 = vsyncadd (%p3835_p4), %s209_s24, 4294966784  ;;  %p3836_p7 = scmp.eq.s32.totalorder %s3223_s19, 0 }
  0x69   : > { %3138 = dma.done.wait (%p3836_p7), [#allocation6], 8192   ;;  %p3837_p8 = pmov %p3836_p7 }
  0x6a   : > { %v3168_v0 = vmov 0   ;;  %v255_v1 = vld [vmem:[#allocation5 + $0x8] sm:$0xff]  ;;  %v258_v2 = vld [vmem:[#allocation5 + $0x20] sm:$0xff]  ;;  %v257_v5 = vld [vmem:[#allocation5 + $0x18] sm:$0xff]  ;;  %vm3170_vm0 = vmmov 0   ;;  %vm440_vm1 = vcmask 261120  }
  0x6b   : > { %3140 = vsyncadd (%p3837_p8), [#allocation6], 4294959104  ;;  %358 = vmatprep.mubr.bf16.mxu0 %v3168_v0  ;;  %v254_v3 = vld [vmem:[#allocation5] sm:$0xff]  ;;  %v303_v4 = vpack.c.bf16 %v258_v2, %v255_v1  ;;  %v261_v6 = vld [vmem:[#allocation5 + $0x38] sm:$0xff]  ;;  %vm681_vm2 = vcmask 1043456   ;;  %vm629_vm3 = vcmask 64512  }
  0x6c   : > { %v264_v7 = vld [vmem:[#allocation5 + $0x50] sm:$0xff]  ;;  %v302_v8 = vpack.c.bf16 %v257_v5, %v254_v3  ;;  %v263_v11 = vld [vmem:[#allocation5 + $0x48] sm:$0xff]  ;;  %v270_v13 = vld [vmem:[#allocation5 + $0x80] sm:$0xff]  ;;  %s3171_s21 = smov 96   ;;  %s3172_s23 = smov 64   ;;  %vm2259_vm4 = vcmask 523264  }
  0x6d   : > { %v306_v9 = vpack.c.bf16 %v264_v7, %v261_v6  ;;  %v260_v10 = vld [vmem:[#allocation5 + $0x30] sm:$0xff]  ;;  %v267_v12 = vld [vmem:[#allocation5 + $0x68] sm:$0xff]  ;;  %326 = vmatprep.subr.bf16.mxu0 %v303_v4  ;;  %v266_v16 = vld [vmem:[#allocation5 + $0x60] sm:$0xff]  ;;  %s3173_s7 = smov 32   ;;  %vm2264_vm5 = vcmask 785408   ;;  %s244_s6 = scalar_lea.vmem [#allocation8], %s2470_s13 }
  0x6e   : > { %327 = vmatpush1.bf16.msra.mxu0 %v302_v8  ;;  %v305_v14 = vpack.c.bf16 %v263_v11, %v260_v10  ;;  %v309_v15 = vpack.c.bf16 %v270_v13, %v267_v12  ;;  %v269_v17 = vld [vmem:[#allocation5 + $0x78] sm:$0xff]  ;;  %v276_v19 = vld [vmem:[#allocation5 + $0xb0] sm:$0xff]  ;;  %v275_v23 = vld [vmem:[#allocation5 + $0xa8] sm:$0xff]  ;;  %s2369_s9 = sshll.u32 %s244_s6, 4  ;;  %s2513_s28 = sshll.u32 %s3223_s19, 9  ;;  %s3771_s9 = int_to_ptr.vmem [resolvable:$true] %s2369_s9 }
  0x6f   : > { %328 = vmatprep.subr.bf16.mxu0 %v306_v9  ;;  %v273_v18 = vld [vmem:[#allocation5 + $0x98] sm:$0xff]  ;;  %v308_v20 = vpack.c.bf16 %v269_v17, %v266_v16  ;;  %v272_v22 = vld [vmem:[#allocation5 + $0x90] sm:$0xff]  ;;  %v279_v24 = vld [vmem:[#allocation5 + $0xc8] sm:$0xff]  ;;  %v3169_v16 = vmov 0.0   ;;  %s3776_s29 = scalar_lea.hbm %s3824_s4, %s2513_s28  ;;  %s2356_s19 = scalar_lea.sflag [#allocation4], %s3380_s10 }
  0x70   : > { %v312_v21 = vpack.c.bf16 %v276_v19, %v273_v18  ;;  %v282_v25 = vld [vmem:[#allocation5 + $0xe0] sm:$0xff]  ;;  %v249_v28 = vld [vmem:[%s3386_s25 + $0x8] sm:$0xff]  ;;  %v311_v29 = vpack.c.bf16 %v275_v23, %v272_v22  ;;  %v256_v31 = vld [vmem:[#allocation5 + $0x10] sm:$0xff]  ;;  %s3089_s5 = scalar_lea.vmem %s3771_s9, 512  ;;  %p3838_p0 = scmp.ne.s32.totalorder %s3833_s26, 0 }
  0x71   : > { %v248_v26 = vld [vmem:[%s3386_s25] sm:$0xff]  ;;  %v259_v32 = vld [vmem:[#allocation5 + $0x28] sm:$0xff]  ;;  %v315_v34 = vpack.c.bf16 %v282_v25, %v279_v24  ;;  %v281_v35 = vld [vmem:[#allocation5 + $0xd8] sm:$0xff]  ;;  %p3090_p11 = scmp.ne.s32.totalorder %s3771_s9, %s3089_s5  ;;  %s3174_s12 = smov [#allocation8]  }
  0x72   : > { %329 = vmatpush1.bf16.msra.mxu0 %v305_v14  ;;  %v278_v27 = vld [vmem:[#allocation5 + $0xc0] sm:$0xff]  ;;  %v3399_v30 = vpack.c.bf16 %v249_v28, %v248_v26  ;;  %v285_v36 = vld [vmem:[#allocation5 + $0xf8] sm:$0xff]  ;;  %v304_v37 = vpack.c.bf16 %v259_v32, %v256_v31  ;;  %v288_v39 = vld [vmem:[#allocation5 + $0x110] sm:$0xff]  ;;  %s3093_s13 = sshll.u32 %s3174_s12, 4  ;;  %s3094_s13 = int_to_ptr.vmem [resolvable:$false] %s3093_s13 }
  0x73   : > { %330 = vmatprep.subr.bf16.mxu0 %v309_v15  ;;  %v262_v33 = vld [vmem:[#allocation5 + $0x40] sm:$0xff]  ;;  %v265_v38 = vld [vmem:[#allocation5 + $0x58] sm:$0xff]  ;;  %v268_v41 = vld [vmem:[#allocation5 + $0x70] sm:$0xff]  ;;  %v314_v43 = vpack.c.bf16 %v281_v35, %v278_v27  ;;  %v318_v44 = vpack.c.bf16 %v288_v39, %v285_v36  ;;  %p3091_p1 = pnand %p3090_p11, %p3838_p0  ;;  %s3095_s24 = scalar_lea.vmem %s3094_s13, 1024 }
  0x74   : > { %v307_v40 = vpack.c.bf16 %v265_v38, %v262_v33  ;;  %v271_v42 = vld [vmem:[#allocation5 + $0x88] sm:$0xff]  ;;  %2614 = vmatprep.mubr.bf16.mxu1 %v3399_v30  ;;  %2598 = vmatprep.subr.bf16.mxu1 %v304_v37  ;;  %v284_v45 = vld [vmem:[#allocation5 + $0xf0] sm:$0xff]  ;;  %v294_v49 = vld [vmem:[#allocation5 + $0x140] sm:$0xff]  ;;  %p3096_p5 = scmp.lt.s32.totalorder %s3771_s9, %s3094_s13  ;;  %p3097_p9 = scmp.lt.s32.totalorder %s3095_s24, %s3089_s5 }
  0x75   : > { %2599 = vmatpush3.bf16.msra.mxu1 %v304_v37  ;;  %v287_v46 = vld [vmem:[#allocation5 + $0x108] sm:$0xff]  ;;  %v310_v48 = vpack.c.bf16 %v271_v42, %v268_v41  ;;  %v274_v50 = vld [vmem:[#allocation5 + $0xa0] sm:$0xff]  ;;  %v277_v51 = vld [vmem:[#allocation5 + $0xb8] sm:$0xff]  ;;  %p3092_p3 = pneg %p3091_p1 }
  0x76   : > { %331 = vmatpush1.bf16.msra.mxu0 %v308_v20  ;;  %v291_v47 = vld [vmem:[#allocation5 + $0x128] sm:$0xff]  ;;  %2600 = vmatprep.subr.bf16.mxu1 %v307_v40  ;;  %v317_v52 = vpack.c.bf16 %v287_v46, %v284_v45  ;;  %v290_v54 = vld [vmem:[#allocation5 + $0x120] sm:$0xff]  ;;  %v293_v55 = vld [vmem:[#allocation5 + $0x138] sm:$0xff]  ;;  %v313_v57 = vpack.c.bf16 %v277_v51, %v274_v50  ;;  %p3098_p12 = por %p3097_p9, %p3096_p5 }
  0x77   : > { %332 = vmatprep.subr.bf16.mxu0 %v312_v21  ;;  %v321_v53 = vpack.c.bf16 %v294_v49, %v291_v47  ;;  %v297_v56 = vld [vmem:[#allocation5 + $0x158] sm:$0xff]  ;;  %v300_v58 = vld [vmem:[#allocation5 + $0x170] sm:$0xff]  ;;  %v283_v60 = vld [vmem:[#allocation5 + $0xe8] sm:$0xff]  ;;  %v320_v61 = vpack.c.bf16 %v293_v55, %v290_v54 }
  0x78   : > { %v280_v59 = vld [vmem:[#allocation5 + $0xd0] sm:$0xff]  ;;  %v324_v62 = vpack.c.bf16 %v300_v58, %v297_v56  ;;  %v299_v1 = vld [vmem:[#allocation5 + $0x168] sm:$0xff]  ;;  %v286_v3 = vld [vmem:[#allocation5 + $0x100] sm:$0xff]  ;;  %p3099_p2 = pnand %p3098_p12, %p3092_p3 }
  0x79   : > { %2601 = vmatpush3.bf16.msra.mxu1 %v307_v40  ;;  %v296_v63 = vld [vmem:[#allocation5 + $0x150] sm:$0xff]  ;;  %v316_v2 = vpack.c.bf16 %v283_v60, %v280_v59  ;;  %v289_v4 = vld [vmem:[#allocation5 + $0x118] sm:$0xff]  ;;  %v295_v8 = vld [vmem:[#allocation5 + $0x148] sm:$0xff] }
  0x7a   : > { %333 = vmatpush1.bf16.msra.mxu0 %v311_v29  ;;  %2602 = vmatprep.subr.bf16.mxu1 %v310_v48  ;;  %v323_v5 = vpack.c.bf16 %v299_v1, %v296_v63  ;;  %v319_v6 = vpack.c.bf16 %v289_v4, %v286_v3  ;;  %v292_v7 = vld [vmem:[#allocation5 + $0x130] sm:$0xff]  ;;  %v251_v11 = vld [vmem:[%s3386_s25 + $0x18] sm:$0xff]  ;;  %v298_v13 = vld [vmem:[#allocation5 + $0x160] sm:$0xff] }
  0x7b   : > { %334 = vmatprep.subr.bf16.mxu0 %v315_v34  ;;  %v322_v9 = vpack.c.bf16 %v295_v8, %v292_v7  ;;  %v250_v10 = vld [vmem:[%s3386_s25 + $0x10] sm:$0xff]  ;;  %v301_v14 = vld [vmem:[#allocation5 + $0x178] sm:$0xff] }
  0x7c   : > { %v253_v12 = vpack.c.bf16 %v251_v11, %v250_v10  ;;  %v325_v15 = vpack.c.bf16 %v301_v14, %v298_v13 }
  0x7d   : > { %2603 = vmatpush3.bf16.msra.mxu1 %v310_v48 }
  0x7e   : > { %335 = vmatpush1.bf16.msra.mxu0 %v314_v43  ;;  %2604 = vmatprep.subr.bf16.mxu1 %v313_v57 }
  0x7f   : > { %336 = vmatprep.subr.bf16.mxu0 %v318_v44 }
  0x81   : > { %2605 = vmatpush3.bf16.msra.mxu1 %v313_v57 }
  0x82   : > { %337 = vmatpush1.bf16.msra.mxu0 %v317_v52  ;;  %2606 = vmatprep.subr.bf16.mxu1 %v316_v2 }
  0x83   : > { %338 = vmatprep.subr.bf16.mxu0 %v321_v53 }
  0x85   : > { %2607 = vmatpush3.bf16.msra.mxu1 %v316_v2 }
  0x86   : > { %339 = vmatpush1.bf16.msra.mxu0 %v320_v61  ;;  %2608 = vmatprep.subr.bf16.mxu1 %v319_v6 }
  0x87   : > { %340 = vmatprep.subr.bf16.mxu0 %v324_v62 }
  0x89   : > { %2609 = vmatpush3.bf16.msra.mxu1 %v319_v6 }
  0x8a   : > { %341 = vmatpush1.bf16.msra.mxu0 %v323_v5  ;;  %2610 = vmatprep.subr.bf16.mxu1 %v322_v9 }
  0x8b   : > { %2618 = vmatprep.subr.bf16.mxu0 %v3169_v16 }
  0x8d   : > { %359 = vmatmul.mubr.bf16.vlgmr.msra.gmra.mrb[0].mxu0 %v3399_v30  ;;  %2611 = vmatpush3.bf16.msra.mxu1 %v322_v9 }
  0x8e   : > { %368 = vmatprep.mubr.bf16.mxu0 %v3168_v0  ;;  %2612 = vmatprep.subr.bf16.mxu1 %v325_v15 }
  0x91   : > { %2613 = vmatpush3.bf16.msra.mxu1 %v325_v15 }
  0x92   : > { %2630 = vmatprep.subr.bf16.mxu1 %v3169_v16 }
  0x94   : > { %2615 = vmatmul.mubr.bf16.vlgmr.msra.gmra.mrb[0].mxu1 %v253_v12 }
  0x95   : > { %369 = vmatmul.mubr.bf16.gmra.mrb[4].mxu0 %v253_v12  ;;  %2632 = vmatprep.mubr.msk.bf16.mxu1 %vm3170_vm0, %v3169_v16 }
  0x96   : > { %2620 = vmatprep.mubr.msk.bf16.mxu0 %vm3170_vm0, %v3169_v16 }
 0x160   : > { %v360_v0 = vpop.f32.mrb[0].mxu0 }
 0x161   : > { %v362_v17 = vpop.f32.mrb[1].mxu0  ;;  %v3419_v25 = vpack.c.bf16 %v360_v0, %v360_v0 }
 0x162   : > { %v3412_v18 = vpack.c.bf16 %v362_v17, %v362_v17  ;;  %v364_v19 = vpop.f32.mrb[2].mxu0 }
 0x163   : > { %v366_v20 = vpop.f32.mrb[3].mxu0  ;;  %v3437_v33 = vpack.c.bf16 %v364_v19, %v364_v19 }
 0x164   : > { %v445_v21 = vsel %vm440_vm1, %v3412_v18, 0  ;;  %v3417_v22 = vpack.c.bf16 %v366_v20, %v366_v20 }
 0x165   : > { %2619 = vmatpush3.bf16.xpose.msra.mxu0 %v445_v21 }
 0x166   : > { %2624 = vmatprep.subr.bf16.mxu0 %v3169_v16  ;;  %v491_v29 = vsel %vm440_vm1, %v3417_v22, 0 }
 0x167   : > { %v3456_v36 = vpop.f32.mrb[0].mxu1 }
 0x168   : > { %v370_v23 = vpop.f32.mrb[4].mxu0  ;;  %v413_v37 = vpop.f32.mrb[1].mxu1 }
 0x169   : > { %v372_v24 = vpop.f32.mrb[5].mxu0  ;;  %v3435_v32 = vpack.c.bf16 %v370_v23, %v370_v23  ;;  %v3458_v38 = vpop.f32.mrb[2].mxu1  ;;  %v3460_v40 = vpack.c.bf16 %v413_v37, %v413_v37 }
 0x16a   : > { %v3421_v26 = vpack.c.bf16 %v372_v24, %v372_v24  ;;  %v374_v27 = vpop.f32.mrb[6].mxu0  ;;  %v416_v39 = vpop.f32.mrb[3].mxu1 }
 0x16b   : > { %v376_v28 = vpop.f32.mrb[7].mxu0  ;;  %v3450_v35 = vpack.c.bf16 %v374_v27, %v374_v27  ;;  %v3462_v41 = vpack.c.bf16 %v416_v39, %v416_v39  ;;  %v683_v42 = vsel %vm681_vm2, %v3460_v40, 0  ;;  %v3496_v39 = vpack.c.bf16 %v3456_v36, %v3456_v36 }
 0x16c   : > { %2621 = vmatmul.mubr.msk.bf16.vlgmr.msra.gmra.mrb[8].mxu0 %vm440_vm1, %v3419_v25  ;;  %v537_v30 = vsel %vm440_vm1, %v3421_v26, 0  ;;  %v3429_v31 = vpack.c.bf16 %v376_v28, %v376_v28  ;;  %v3506_v36 = vpack.c.bf16 %v3458_v38, %v3458_v38 }
 0x16d   : > { %2625 = vmatpush3.bf16.xpose.msra.mxu0 %v491_v29  ;;  %2631 = vmatpush3.bf16.xpose.msra.mxu1 %v537_v30  ;;  %v729_v43 = vsel %vm681_vm2, %v3462_v41, 0 }
 0x16e   : > { %2626 = vmatprep.mubr.msk.bf16.mxu0 %vm3170_vm0, %v3169_v16  ;;  %2636 = vmatprep.subr.bf16.mxu0 %v3169_v16  ;;  %v583_v34 = vsel %vm440_vm1, %v3429_v31, 0 }
 0x16f   : > { %2642 = vmatprep.subr.bf16.mxu1 %v3169_v16 }
 0x174   : > { %2627 = vmatmul.mubr.msk.bf16.vlgmr.msra.gmra.mrb[12].mxu0 %vm440_vm1, %v3437_v33  ;;  %2633 = vmatmul.mubr.msk.bf16.vlgmr.msra.gmra.mrb[4].mxu1 %vm440_vm1, %v3435_v32 }
 0x175   : > { %2637 = vmatpush3.bf16.xpose.msra.mxu0 %v583_v34  ;;  %2638 = vmatprep.mubr.msk.bf16.mxu0 %vm3170_vm0, %v3169_v16 }
 0x176   : > { %2648 = vmatprep.subr.bf16.mxu0 %v3169_v16  ;;  %2644 = vmatprep.mubr.msk.bf16.mxu1 %vm3170_vm0, %v3169_v16 }
 0x177   : > { %2643 = vmatpush3.bf16.msra.mxu1 %v683_v42 }
 0x178   : > { %2654 = vmatprep.subr.bf16.mxu1 %v3169_v16 }
 0x17c   : > { %2639 = vmatmul.mubr.msk.bf16.vlgmr.msra.gmra.mrb[16].mxu0 %vm440_vm1, %v3450_v35 }
 0x17d   : > { %2650 = vmatprep.mubr.msk.bf16.mxu0 %vm3170_vm0, %v3169_v16  ;;  %2649 = vmatpush3.bf16.msra.mxu0 %v729_v43 }
 0x17e   : > { %2660 = vmatprep.subr.bf16.mxu0 %v3169_v16 }
 0x23f   : > { %v481_v44 = vpop.f32.mrb[8].mxu0 }
 0x240   : > { %v625_v45 = vmul.f32 0.17677669, %v481_v44  ;;  %v2622_v46 = vpop.f32.mrb[9].mxu0  ;;  %v775_v44 = vsel %vm681_vm2, %v3496_v39, 0 }
 0x241   : > { %v484_v47 = vpop.f32.mrb[10].mxu0 }
 0x242   : > { %v2623_v48 = vpop.f32.mrb[11].mxu0  ;;  %v630_v49 = vsel %vm629_vm3, %v625_v45, -inf }
 0x243   : > { %631 = vmax.xlane.f32.xlu0 %v630_v49 }
 0x247   : > { %v527_v50 = vpop.f32.mrb[12].mxu0  ;;  %v573_v51 = vpop.f32.mrb[4].mxu1 }
 0x248   : > { %v626_v52 = vmul.f32 0.17677669, %v527_v50  ;;  %v627_v53 = vmul.f32 0.17677669, %v573_v51  ;;  %v2628_v54 = vpop.f32.mrb[13].mxu0  ;;  %v2634_v55 = vpop.f32.mrb[5].mxu1 }
 0x249   : > { %v530_v56 = vpop.f32.mrb[14].mxu0  ;;  %v576_v57 = vpop.f32.mrb[6].mxu1 }
 0x24a   : > { %v2629_v58 = vpop.f32.mrb[15].mxu0  ;;  %v636_v59 = vsel %vm629_vm3, %v627_v53, -inf  ;;  %v633_v60 = vsel %vm629_vm3, %v626_v52, -inf  ;;  %v2635_v61 = vpop.f32.mrb[7].mxu1 }
 0x24b   : > { %637 = vmax.xlane.f32.xlu1 %v636_v59  ;;  %634 = vmax.xlane.f32.xlu0 %v633_v60 }
 0x24f   : > { %v619_v62 = vpop.f32.mrb[16].mxu0 }
 0x250   : > { %v628_v63 = vmul.f32 0.17677669, %v619_v62  ;;  %v2640_v1 = vpop.f32.mrb[17].mxu0 }
 0x251   : > { %v622_v2 = vpop.f32.mrb[18].mxu0 }
 0x252   : > { %v639_v3 = vsel %vm629_vm3, %v628_v63, -inf  ;;  %v2641_v4 = vpop.f32.mrb[19].mxu0 }
 0x253   : > { %640 = vmax.xlane.f32.xlu1 %v639_v3 }
 0x2d0   : > { %v632_v5 = vpop.xlane.xlu0 %631 }
 0x2d1   : > { %v642_v6 = vsub.f32 %v625_v45, %v632_v5 }
 0x2d3   : > { %v646_v7 = vmul.f32 1.442695, %v642_v6 }
 0x2d5   : > { %2939 = vpow2.f32 %v646_v7 }
 0x2d8   : > { %v638_v8 = vpop.xlane.xlu1 %637  ;;  %v635_v9 = vpop.xlane.xlu0 %634 }
 0x2d9   : > { %v644_v10 = vsub.f32 %v627_v53, %v638_v8  ;;  %v643_v11 = vsub.f32 %v626_v52, %v635_v9  ;;  %v821_v53 = vsel %vm681_vm2, %v3506_v36, 0 }
 0x2db   : > { %v650_v12 = vmul.f32 1.442695, %v644_v10  ;;  %v648_v13 = vmul.f32 1.442695, %v643_v11 }
 0x2dd   : > { %2941 = vpow2.f32 %v650_v12 }
 0x2de   : > { %2943 = vpow2.f32 %v648_v13 }
 0x2df   : > { %v2940_v14 = vpop.eup %2939 }
 0x2e0   : > { %v654_v15 = vsel %vm629_vm3, %v2940_v14, 0.0  ;;  %v641_v21 = vpop.xlane.xlu1 %640 }
 0x2e1   : > { %655 = vadd.xlane.f32.xlu0 %v654_v15  ;;  %v645_v23 = vsub.f32 %v628_v63, %v641_v21 }
 0x2e3   : > { %v652_v24 = vmul.f32 1.442695, %v645_v23 }
 0x2e5   : > { %2945 = vpow2.f32 %v652_v24 }
 0x2e7   : > { %v2942_v0 = vpop.eup %2941 }
 0x2e8   : > { %v2944_v17 = vpop.eup %2943  ;;  %v660_v19 = vsel %vm629_vm3, %v2942_v0, 0.0 }
 0x2e9   : > { %661 = vadd.xlane.f32.xlu0 %v660_v19  ;;  %v657_v20 = vsel %vm629_vm3, %v2944_v17, 0.0 }
 0x2ea   : > { %658 = vadd.xlane.f32.xlu1 %v657_v20 }
 0x2ef   : > { %v2946_v27 = vpop.eup %2945 }
 0x2f0   : > { %v663_v28 = vsel %vm629_vm3, %v2946_v27, 0.0 }
 0x2fb   : > { %919 = vrot.lane.b32.xlu1 %v3417_v22, %s3171_s21 }
 0x2ff   : > { %864 = vrot.lane.b32.xlu1 %v3419_v25, %s3171_s21  ;;  %867 = vrot.lane.b32.xlu0 %v3412_v18, %s3171_s21 }
 0x303   : > { %971 = vrot.lane.b32.xlu0 %v3421_v26, %s3171_s21 }
 0x307   : > { %968 = vrot.lane.b32.xlu0 %v3435_v32, %s3171_s21 }
 0x323   : > { %664 = vadd.xlane.f32.xlu1 %v663_v28 }
 0x334   : > { %916 = vrot.lane.b32.xlu1 %v3437_v33, %s3171_s21 }
 0x338   : > { %1023 = vrot.lane.b32.xlu1 %v3429_v31, %s3171_s21 }
 0x33c   : > { %1020 = vrot.lane.b32.xlu1 %v3450_v35, %s3171_s21 }
 0x36e   : > { %v656_v29 = vpop.xlane.xlu0 %655 }
 0x36f   : > { %2947 = vrcp.f32 %v656_v29 }
 0x376   : > { %v662_v30 = vpop.xlane.xlu0 %661 }
 0x377   : > { %2949 = vrcp.f32 %v662_v30  ;;  %v659_v34 = vpop.xlane.xlu1 %658 }
 0x378   : > { %2951 = vrcp.f32 %v659_v34 }
 0x379   : > { %v2948_v37 = vpop.eup %2947 }
 0x37a   : > { %v667_v42 = vmul.f32 %v2948_v37, %v2940_v14  ;;  %v868_v49 = vpop.permute.xlu0 %867 }
 0x37b   : > { %v873_v52 = vsel %vm440_vm1, %v868_v49, 0  ;;  %v920_v54 = vpop.permute.xlu1 %919 }
 0x37c   : > { %v674_v43 = vpack.c.bf16 %v667_v42, %v667_v42  ;;  %v925_v63 = vsel %vm440_vm1, %v920_v54, 0 }
 0x37e   : > { %2645 = vmatmul.mubr.msk.bf16.vlgmr.msra.gmra.mrb[8].mxu1 %vm629_vm3, %v674_v43  ;;  %v972_v38 = vpop.permute.xlu0 %971 }
 0x37f   : > { %2655 = vmatpush3.bf16.msra.mxu1 %v775_v44  ;;  %2656 = vmatprep.mubr.msk.bf16.mxu1 %vm3170_vm0, %v3169_v16  ;;  %v865_v55 = vpop.permute.xlu1 %864  ;;  %v977_v56 = vsel %vm440_vm1, %v972_v38, 0 }
 0x380   : > { %2666 = vmatprep.subr.bf16.mxu1 %v3169_v16 }
 0x381   : > { %v2950_v45 = vpop.eup %2949 }
 0x382   : > { %v2952_v46 = vpop.eup %2951  ;;  %v671_v47 = vmul.f32 %v2950_v45, %v2942_v0  ;;  %v969_v57 = vpop.permute.xlu0 %968 }
 0x383   : > { %v669_v48 = vmul.f32 %v2952_v46, %v2944_v17 }
 0x384   : > { %v676_v50 = vpack.c.bf16 %v671_v47, %v671_v47 }
 0x385   : > { %v675_v51 = vpack.c.bf16 %v669_v48, %v669_v48 }
 0x386   : > { %2657 = vmatmul.mubr.msk.bf16.vlgmr.msra.gmra.mrb[12].mxu1 %vm629_vm3, %v676_v50 }
 0x387   : > { %2651 = vmatmul.mubr.msk.bf16.vlgmr.msra.gmra.mrb[20].mxu0 %vm629_vm3, %v675_v51  ;;  %2668 = vmatprep.mubr.msk.bf16.mxu1 %vm3170_vm0, %v3169_v16 }
 0x388   : > { %2661 = vmatpush3.bf16.msra.mxu0 %v821_v53  ;;  %2667 = vmatpush3.bf16.xpose.msra.mxu1 %v873_v52 }
 0x389   : > { %2678 = vmatprep.subr.bf16.mxu1 %v3169_v16  ;;  %2662 = vmatprep.mubr.msk.bf16.mxu0 %vm3170_vm0, %v3169_v16 }
 0x38a   : > { %2672 = vmatprep.subr.bf16.mxu0 %v3169_v16 }
 0x38f   : > { %2669 = vmatmul.mubr.msk.bf16.vlgmr.msra.gmra.mrb[16].mxu1 %vm440_vm1, %v865_v55 }
 0x390   : > { %2679 = vmatpush3.bf16.xpose.msra.mxu1 %v977_v56  ;;  %2680 = vmatprep.mubr.msk.bf16.mxu1 %vm3170_vm0, %v3169_v16 }
 0x391   : > { %2690 = vmatprep.subr.bf16.mxu1 %v3169_v16 }
 0x397   : > { %2681 = vmatmul.mubr.msk.bf16.vlgmr.msra.gmra.mrb[20].mxu1 %vm440_vm1, %v969_v57 }
 0x398   : > { %2692 = vmatprep.mubr.msk.bf16.mxu1 %vm3170_vm0, %v3169_v16 }
 0x3b0   : > { %v665_v58 = vpop.xlane.xlu1 %664 }
 0x3b1   : > { %2953 = vrcp.f32 %v665_v58 }
 0x3b4   : > { %v917_v62 = vpop.permute.xlu1 %916 }
 0x3b8   : > { %v1024_v1 = vpop.permute.xlu1 %1023 }
 0x3b9   : > { %v1029_v2 = vsel %vm440_vm1, %v1024_v1, 0 }
 0x3bb   : > { %v2954_v59 = vpop.eup %2953 }
 0x3bc   : > { %v673_v60 = vmul.f32 %v2954_v59, %v2946_v27  ;;  %v1021_v3 = vpop.permute.xlu1 %1020 }
 0x3be   : > { %v677_v61 = vpack.c.bf16 %v673_v60, %v673_v60 }
 0x3c0   : > { %2663 = vmatmul.mubr.msk.bf16.vlgmr.msra.gmra.mrb[24].mxu0 %vm629_vm3, %v677_v61 }
 0x3c1   : > { %2673 = vmatpush3.bf16.xpose.msra.mxu0 %v925_v63  ;;  %2674 = vmatprep.mubr.msk.bf16.mxu0 %vm3170_vm0, %v3169_v16 }
 0x3c2   : > { %2684 = vmatprep.subr.bf16.mxu0 %v3169_v16 }
 0x3c8   : > { %2675 = vmatmul.mubr.msk.bf16.vlgmr.msra.gmra.mrb[28].mxu0 %vm440_vm1, %v917_v62 }
 0x3c9   : > { %2685 = vmatpush3.bf16.xpose.msra.mxu0 %v1029_v2  ;;  %2686 = vmatprep.mubr.msk.bf16.mxu0 %vm3170_vm0, %v3169_v16 }
 0x3ca   : > { %2696 = vmatprep.subr.bf16.mxu0 %v3169_v16 }
 0x3d0   : > { %2687 = vmatmul.mubr.msk.bf16.vlgmr.msra.gmra.mrb[32].mxu0 %vm440_vm1, %v1021_v3 }
 0x3d1   : > { %2698 = vmatprep.mubr.msk.bf16.mxu0 %vm3170_vm0, %v3169_v16 }
 0x451   : > { %v3540_v4 = vpop.f32.mrb[8].mxu1 }
 0x452   : > { %v2646_v5 = vpop.f32.mrb[9].mxu1 }
 0x453   : > { %v722_v6 = vpop.f32.mrb[10].mxu1 }
 0x454   : > { %v2647_v7 = vpop.f32.mrb[11].mxu1 }
 0x459   : > { %v3542_v8 = vpop.f32.mrb[12].mxu1 }
 0x45a   : > { %v3544_v9 = vpop.f32.mrb[20].mxu0  ;;  %v2658_v10 = vpop.f32.mrb[13].mxu1 }
 0x45b   : > { %v2652_v11 = vpop.f32.mrb[21].mxu0  ;;  %v814_v12 = vpop.f32.mrb[14].mxu1 }
 0x45c   : > { %v768_v13 = vpop.f32.mrb[22].mxu0  ;;  %v2659_v14 = vpop.f32.mrb[15].mxu1 }
 0x45d   : > { %v2653_v15 = vpop.f32.mrb[23].mxu0 }
 0x462   : > { %v909_v0 = vpop.f32.mrb[16].mxu1 }
 0x463   : > { %v1071_v17 = vmul.f32 0.17677669, %v909_v0  ;;  %v2670_v19 = vpop.f32.mrb[17].mxu1 }
 0x464   : > { %v912_v20 = vpop.f32.mrb[18].mxu1 }
 0x465   : > { %v2671_v21 = vpop.f32.mrb[19].mxu1  ;;  %v1075_v23 = vsel %vm629_vm3, %v1071_v17, -inf }
 0x466   : > { %1076 = vmax.xlane.f32.xlu0 %v1075_v23 }
 0x46a   : > { %v1013_v24 = vpop.f32.mrb[20].mxu1 }
 0x46b   : > { %v1073_v27 = vmul.f32 0.17677669, %v1013_v24  ;;  %v2682_v28 = vpop.f32.mrb[21].mxu1 }
 0x46c   : > { %v1016_v29 = vpop.f32.mrb[22].mxu1 }
 0x46d   : > { %v2683_v30 = vpop.f32.mrb[23].mxu1  ;;  %v1081_v34 = vsel %vm629_vm3, %v1073_v27, -inf }
 0x46e   : > { %1082 = vmax.xlane.f32.xlu0 %v1081_v34 }
 0x493   : > { %v3548_v37 = vpop.f32.mrb[24].mxu0 }
 0x494   : > { %v2664_v42 = vpop.f32.mrb[25].mxu0 }
 0x495   : > { %v860_v43 = vpop.f32.mrb[26].mxu0 }
 0x496   : > { %v2665_v44 = vpop.f32.mrb[27].mxu0 }
 0x49b   : > { %v961_v45 = vpop.f32.mrb[28].mxu0 }
 0x49c   : > { %v1072_v46 = vmul.f32 0.17677669, %v961_v45  ;;  %v2676_v47 = vpop.f32.mrb[29].mxu0 }
 0x49d   : > { %v964_v48 = vpop.f32.mrb[30].mxu0 }
 0x49e   : > { %v2677_v49 = vpop.f32.mrb[31].mxu0  ;;  %v1078_v50 = vsel %vm629_vm3, %v1072_v46, -inf }
 0x49f   : > { %1079 = vmax.xlane.f32.xlu1 %v1078_v50 }
 0x4a3   : > { %v1065_v51 = vpop.f32.mrb[32].mxu0 }
 0x4a4   : > { %v1074_v52 = vmul.f32 0.17677669, %v1065_v51  ;;  %v2688_v53 = vpop.f32.mrb[33].mxu0 }
 0x4a5   : > { %v1068_v54 = vpop.f32.mrb[34].mxu0 }
 0x4a6   : > { %v2689_v38 = vpop.f32.mrb[35].mxu0  ;;  %v1084_v55 = vsel %vm629_vm3, %v1074_v52, -inf }
 0x4a7   : > { %1085 = vmax.xlane.f32.xlu0 %v1084_v55 }
 0x4b0   : > { %1173 = vrot.lane.b32.xlu1 %v3462_v41, %s3171_s21 }
 0x4b4   : > { %1222 = vrot.lane.b32.xlu1 %v3496_v39, %s3171_s21 }
 0x4b8   : > { %1271 = vrot.lane.b32.xlu1 %v3506_v36, %s3171_s21 }
 0x4f3   : > { %v1077_v56 = vpop.xlane.xlu0 %1076 }
 0x4f4   : > { %v1087_v57 = vsub.f32 %v1071_v17, %v1077_v56 }
 0x4f6   : > { %v1091_v58 = vmul.f32 1.442695, %v1087_v57 }
 0x4f8   : > { %2955 = vpow2.f32 %v1091_v58 }
 0x4fb   : > { %v1083_v61 = vpop.xlane.xlu0 %1082 }
 0x4fc   : > { %v1089_v62 = vsub.f32 %v1073_v27, %v1083_v61 }
 0x4fe   : > { %v1095_v63 = vmul.f32 1.442695, %v1089_v62 }
 0x500   : > { %2957 = vpow2.f32 %v1095_v63 }
 0x502   : > { %v2956_v59 = vpop.eup %2955 }
 0x503   : > { %v1099_v60 = vsel %vm629_vm3, %v2956_v59, 0.0 }
 0x504   : > { %1100 = vadd.xlane.f32.xlu0 %v1099_v60 }
 0x50a   : > { %v2958_v7 = vpop.eup %2957 }
 0x50b   : > { %v1105_v10 = vsel %vm629_vm3, %v2958_v7, 0.0 }
 0x51a   : > { %1124 = vrot.lane.b32.xlu0 %v3460_v40, %s3171_s21 }
 0x52c   : > { %v1080_v1 = vpop.xlane.xlu1 %1079 }
 0x52d   : > { %v1088_v2 = vsub.f32 %v1072_v46, %v1080_v1 }
 0x52f   : > { %v1093_v3 = vmul.f32 1.442695, %v1088_v2 }
 0x530   : > { %v1174_v5 = vpop.permute.xlu1 %1173 }
 0x531   : > { %2959 = vpow2.f32 %v1093_v3  ;;  %v1179_v6 = vsel %vm681_vm2, %v1174_v5, 0 }
 0x532   : > { %2697 = vmatpush3.bf16.msra.mxu0 %v1179_v6 }
 0x533   : > { %2708 = vmatprep.subr.bf16.mxu0 %v3169_v16 }
 0x534   : > { %v1086_v13 = vpop.xlane.xlu0 %1085  ;;  %v1223_v27 = vpop.permute.xlu1 %1222 }
 0x535   : > { %v1090_v14 = vsub.f32 %v1074_v52, %v1086_v13  ;;  %v1228_v29 = vsel %vm681_vm2, %v1223_v27, 0 }
 0x537   : > { %v1097_v15 = vmul.f32 1.442695, %v1090_v14 }
 0x538   : > { %v1272_v30 = vpop.permute.xlu1 %1271 }
 0x539   : > { %1106 = vadd.xlane.f32.xlu0 %v1105_v10  ;;  %2961 = vpow2.f32 %v1097_v15  ;;  %v1277_v52 = vsel %vm681_vm2, %v1272_v30, 0 }
 0x53b   : > { %v2960_v11 = vpop.eup %2959 }
 0x53c   : > { %v1102_v12 = vsel %vm629_vm3, %v2960_v11, 0.0 }
 0x53d   : > { %1103 = vadd.xlane.f32.xlu1 %v1102_v12 }
 0x543   : > { %v2962_v0 = vpop.eup %2961 }
 0x544   : > { %v1108_v17 = vsel %vm629_vm3, %v2962_v0, 0.0 }
 0x54e   : > { %1371 = vrot.lane.b32.xlu1 %v3417_v22, %s3172_s23 }
 0x54f   : > { %1321 = vrot.lane.b32.xlu0 %v3412_v18, %s3172_s23 }
 0x553   : > { %1319 = vrot.lane.b32.xlu0 %v3419_v25, %s3172_s23 }
 0x557   : > { %1421 = vrot.lane.b32.xlu0 %v3421_v26, %s3172_s23 }
 0x55b   : > { %1419 = vrot.lane.b32.xlu0 %v3435_v32, %s3172_s23 }
 0x572   : > { %1109 = vadd.xlane.f32.xlu1 %v1108_v17 }
 0x583   : > { %1369 = vrot.lane.b32.xlu1 %v3437_v33, %s3172_s23 }
 0x587   : > { %1471 = vrot.lane.b32.xlu1 %v3429_v31, %s3172_s23 }
 0x58b   : > { %1469 = vrot.lane.b32.xlu1 %v3450_v35, %s3172_s23 }
 0x591   : > { %v1101_v19 = vpop.xlane.xlu0 %1100 }
 0x592   : > { %2963 = vrcp.f32 %v1101_v19 }
 0x595   : > { %v1125_v20 = vpop.permute.xlu0 %1124 }
 0x596   : > { %v1130_v21 = vsel %vm681_vm2, %v1125_v20, 0 }
 0x597   : > { %2691 = vmatpush3.bf16.msra.mxu1 %v1130_v21 }
 0x598   : > { %2702 = vmatprep.subr.bf16.mxu1 %v3169_v16 }
 0x59c   : > { %v2964_v23 = vpop.eup %2963 }
 0x59d   : > { %v1112_v24 = vmul.f32 %v2964_v23, %v2956_v59 }
 0x59f   : > { %v1119_v28 = vpack.c.bf16 %v1112_v24, %v1112_v24 }
 0x5a1   : > { %2693 = vmatmul.mubr.msk.bf16.vlgmr.msra.gmra.mrb[24].mxu1 %vm629_vm3, %v1119_v28 }
 0x5a2   : > { %2703 = vmatpush3.bf16.msra.mxu1 %v1228_v29  ;;  %2704 = vmatprep.mubr.msk.bf16.mxu1 %vm3170_vm0, %v3169_v16 }
 0x5a3   : > { %2714 = vmatprep.subr.bf16.mxu1 %v3169_v16 }
 0x5c6   : > { %v1107_v34 = vpop.xlane.xlu0 %1106 }
 0x5c7   : > { %2965 = vrcp.f32 %v1107_v34 }
 0x5ca   : > { %v1104_v42 = vpop.xlane.xlu1 %1103  ;;  %v1322_v43 = vpop.permute.xlu0 %1321 }
 0x5cb   : > { %2967 = vrcp.f32 %v1104_v42  ;;  %v1327_v50 = vsel %vm440_vm1, %v1322_v43, 0 }
 0x5ce   : > { %v1320_v48 = vpop.permute.xlu0 %1319  ;;  %v1372_v55 = vpop.permute.xlu1 %1371 }
 0x5cf   : > { %v1377_v61 = vsel %vm440_vm1, %v1372_v55, 0 }
 0x5d1   : > { %v2966_v44 = vpop.eup %2965 }
 0x5d2   : > { %v1116_v45 = vmul.f32 %v2966_v44, %v2958_v7  ;;  %v1422_v53 = vpop.permute.xlu0 %1421 }
 0x5d3   : > { %v1427_v54 = vsel %vm440_vm1, %v1422_v53, 0 }
 0x5d4   : > { %v1121_v46 = vpack.c.bf16 %v1116_v45, %v1116_v45 }
 0x5d5   : > { %v2968_v47 = vpop.eup %2967 }
 0x5d6   : > { %v1114_v49 = vmul.f32 %v2968_v47, %v2960_v11  ;;  %2705 = vmatmul.mubr.msk.bf16.vlgmr.msra.gmra.mrb[28].mxu1 %vm629_vm3, %v1121_v46  ;;  %v1420_v38 = vpop.permute.xlu0 %1419 }
 0x5d7   : > { %2715 = vmatpush3.bf16.xpose.msra.mxu1 %v1327_v50  ;;  %2716 = vmatprep.mubr.msk.bf16.mxu1 %vm3170_vm0, %v3169_v16 }
 0x5d8   : > { %v1120_v51 = vpack.c.bf16 %v1114_v49, %v1114_v49  ;;  %2726 = vmatprep.subr.bf16.mxu1 %v3169_v16 }
 0x5da   : > { %2699 = vmatmul.mubr.msk.bf16.vlgmr.msra.gmra.mrb[36].mxu0 %vm629_vm3, %v1120_v51 }
 0x5db   : > { %2709 = vmatpush3.bf16.msra.mxu0 %v1277_v52  ;;  %2710 = vmatprep.mubr.msk.bf16.mxu0 %vm3170_vm0, %v3169_v16 }
 0x5dc   : > { %2720 = vmatprep.subr.bf16.mxu0 %v3169_v16 }
 0x5de   : > { %2717 = vmatmul.mubr.msk.bf16.vlgmr.msra.gmra.mrb[32].mxu1 %vm440_vm1, %v1320_v48 }
 0x5df   : > { %2727 = vmatpush3.bf16.xpose.msra.mxu1 %v1427_v54  ;;  %2728 = vmatprep.mubr.msk.bf16.mxu1 %vm3170_vm0, %v3169_v16 }
 0x5e0   : > { %2738 = vmatprep.subr.bf16.mxu1 %v3169_v16 }
 0x5e6   : > { %2729 = vmatmul.mubr.msk.bf16.vlgmr.msra.gmra.mrb[36].mxu1 %vm440_vm1, %v1420_v38 }
 0x5e7   : > { %2740 = vmatprep.mubr.msk.bf16.mxu1 %vm3170_vm0, %v3169_v16 }
 0x5ff   : > { %v1110_v56 = vpop.xlane.xlu1 %1109 }
 0x600   : > { %2969 = vrcp.f32 %v1110_v56 }
 0x603   : > { %v1370_v60 = vpop.permute.xlu1 %1369 }
 0x607   : > { %v1472_v62 = vpop.permute.xlu1 %1471 }
 0x608   : > { %v1477_v63 = vsel %vm440_vm1, %v1472_v62, 0 }
 0x60a   : > { %v2970_v57 = vpop.eup %2969 }
 0x60b   : > { %v1118_v58 = vmul.f32 %v2970_v57, %v2962_v0  ;;  %v1470_v1 = vpop.permute.xlu1 %1469 }
 0x60d   : > { %v1122_v59 = vpack.c.bf16 %v1118_v58, %v1118_v58 }
 0x60f   : > { %2711 = vmatmul.mubr.msk.bf16.vlgmr.msra.gmra.mrb[40].mxu0 %vm629_vm3, %v1122_v59 }
 0x610   : > { %2721 = vmatpush3.bf16.xpose.msra.mxu0 %v1377_v61  ;;  %2722 = vmatprep.mubr.msk.bf16.mxu0 %vm3170_vm0, %v3169_v16 }
 0x611   : > { %2732 = vmatprep.subr.bf16.mxu0 %v3169_v16 }
 0x617   : > { %2723 = vmatmul.mubr.msk.bf16.vlgmr.msra.gmra.mrb[44].mxu0 %vm440_vm1, %v1370_v60 }
 0x618   : > { %2733 = vmatpush3.bf16.xpose.msra.mxu0 %v1477_v63  ;;  %2734 = vmatprep.mubr.msk.bf16.mxu0 %vm3170_vm0, %v3169_v16 }
 0x619   : > { %2744 = vmatprep.subr.bf16.mxu0 %v3169_v16 }
 0x61f   : > { %2735 = vmatmul.mubr.msk.bf16.vlgmr.msra.gmra.mrb[48].mxu0 %vm440_vm1, %v1470_v1 }
 0x620   : > { %2746 = vmatprep.mubr.msk.bf16.mxu0 %vm3170_vm0, %v3169_v16 }
 0x674   : > { %v3620_v2 = vpop.f32.mrb[24].mxu1 }
 0x675   : > { %v2694_v3 = vpop.f32.mrb[25].mxu1 }
 0x676   : > { %v1169_v5 = vpop.f32.mrb[26].mxu1 }
 0x677   : > { %v2695_v6 = vpop.f32.mrb[27].mxu1 }
 0x6a9   : > { %v3622_v7 = vpop.f32.mrb[28].mxu1 }
 0x6aa   : > { %v2706_v10 = vpop.f32.mrb[29].mxu1 }
 0x6ab   : > { %v1267_v11 = vpop.f32.mrb[30].mxu1 }
 0x6ac   : > { %v2707_v12 = vpop.f32.mrb[31].mxu1 }
 0x6ad   : > { %v3624_v13 = vpop.f32.mrb[36].mxu0 }
 0x6ae   : > { %v2909_v14 = vpack.i.bf16 %v3624_v13, %v3620_v2  ;;  %v2700_v15 = vpop.f32.mrb[37].mxu0 }
 0x6af   : > { %v1218_v0 = vpop.f32.mrb[38].mxu0 }
 0x6b0   : > { %v2701_v17 = vpop.f32.mrb[39].mxu0 }
 0x6b1   : > { %v1363_v19 = vpop.f32.mrb[32].mxu1 }
 0x6b2   : > { %v1519_v20 = vmul.f32 0.17677669, %v1363_v19  ;;  %v2718_v21 = vpop.f32.mrb[33].mxu1 }
 0x6b3   : > { %v1366_v23 = vpop.f32.mrb[34].mxu1 }
 0x6b4   : > { %v2719_v24 = vpop.f32.mrb[35].mxu1  ;;  %v1523_v27 = vsel %vm629_vm3, %v1519_v20, -inf }
 0x6b5   : > { %1524 = vmax.xlane.f32.xlu0 %v1523_v27 }
 0x6b9   : > { %v1463_v28 = vpop.f32.mrb[36].mxu1 }
 0x6ba   : > { %v1521_v29 = vmul.f32 0.17677669, %v1463_v28  ;;  %v2730_v30 = vpop.f32.mrb[37].mxu1 }
 0x6bb   : > { %v1466_v34 = vpop.f32.mrb[38].mxu1 }
 0x6bc   : > { %v2731_v42 = vpop.f32.mrb[39].mxu1  ;;  %v1529_v43 = vsel %vm629_vm3, %v1521_v29, -inf }
 0x6bd   : > { %1530 = vmax.xlane.f32.xlu0 %v1529_v43 }
 0x6e2   : > { %v3630_v44 = vpop.f32.mrb[40].mxu0 }
 0x6e3   : > { %v2914_v45 = vpack.i.bf16 %v3630_v44, %v3622_v7  ;;  %v2712_v46 = vpop.f32.mrb[41].mxu0 }
 0x6e4   : > { %v1316_v47 = vpop.f32.mrb[42].mxu0 }
 0x6e5   : > { %v2713_v48 = vpop.f32.mrb[43].mxu0 }
 0x6ea   : > { %v1413_v49 = vpop.f32.mrb[44].mxu0 }
 0x6eb   : > { %v1520_v50 = vmul.f32 0.17677669, %v1413_v49  ;;  %v2724_v51 = vpop.f32.mrb[45].mxu0 }
 0x6ec   : > { %v1416_v52 = vpop.f32.mrb[46].mxu0 }
 0x6ed   : > { %v2725_v53 = vpop.f32.mrb[47].mxu0  ;;  %v1526_v54 = vsel %vm629_vm3, %v1520_v50, -inf }
 0x6ee   : > { %1527 = vmax.xlane.f32.xlu1 %v1526_v54 }
 0x6f2   : > { %v1513_v38 = vpop.f32.mrb[48].mxu0 }
 0x6f3   : > { %v1522_v55 = vmul.f32 0.17677669, %v1513_v38  ;;  %v2736_v56 = vpop.f32.mrb[49].mxu0 }
 0x6f4   : > { %v1516_v57 = vpop.f32.mrb[50].mxu0 }
 0x6f5   : > { %v2737_v58 = vpop.f32.mrb[51].mxu0  ;;  %v1532_v59 = vsel %vm629_vm3, %v1522_v55, -inf }
 0x6f6   : > { %1533 = vmax.xlane.f32.xlu0 %v1532_v59 }
 0x6ff   : > { %1619 = vrot.lane.b32.xlu1 %v3462_v41, %s3172_s23 }
 0x703   : > { %1667 = vrot.lane.b32.xlu1 %v3496_v39, %s3172_s23 }
 0x707   : > { %1715 = vrot.lane.b32.xlu1 %v3506_v36, %s3172_s23 }
 0x742   : > { %v1525_v60 = vpop.xlane.xlu0 %1524 }
 0x743   : > { %v1535_v61 = vsub.f32 %v1519_v20, %v1525_v60 }
 0x745   : > { %v1539_v62 = vmul.f32 1.442695, %v1535_v61 }
 0x747   : > { %2971 = vpow2.f32 %v1539_v62 }
 0x74a   : > { %v1531_v3 = vpop.xlane.xlu0 %1530 }
 0x74b   : > { %v1537_v5 = vsub.f32 %v1521_v29, %v1531_v3 }
 0x74d   : > { %v1543_v6 = vmul.f32 1.442695, %v1537_v5 }
 0x74f   : > { %2973 = vpow2.f32 %v1543_v6 }
 0x751   : > { %v2972_v63 = vpop.eup %2971 }
 0x752   : > { %v1547_v1 = vsel %vm629_vm3, %v2972_v63, 0.0 }
 0x753   : > { %1548 = vadd.xlane.f32.xlu0 %v1547_v1 }
 0x759   : > { %v2974_v17 = vpop.eup %2973 }
 0x75a   : > { %v1553_v19 = vsel %vm629_vm3, %v2974_v17, 0.0 }
 0x769   : > { %1571 = vrot.lane.b32.xlu0 %v3460_v40, %s3172_s23 }
 0x77b   : > { %v1528_v10 = vpop.xlane.xlu1 %1527 }
 0x77c   : > { %v1536_v11 = vsub.f32 %v1520_v50, %v1528_v10 }
 0x77e   : > { %v1541_v12 = vmul.f32 1.442695, %v1536_v11 }
 0x77f   : > { %v1620_v15 = vpop.permute.xlu1 %1619 }
 0x780   : > { %2975 = vpow2.f32 %v1541_v12  ;;  %v1625_v0 = vsel %vm681_vm2, %v1620_v15, 0 }
 0x781   : > { %2745 = vmatpush3.bf16.msra.mxu0 %v1625_v0 }
 0x782   : > { %2756 = vmatprep.subr.bf16.mxu0 %v3169_v16 }
 0x783   : > { %v1534_v23 = vpop.xlane.xlu0 %1533  ;;  %v1668_v30 = vpop.permute.xlu1 %1667 }
 0x784   : > { %v1538_v24 = vsub.f32 %v1522_v55, %v1534_v23 }
 0x786   : > { %v1545_v27 = vmul.f32 1.442695, %v1538_v24 }
 0x788   : > { %1554 = vadd.xlane.f32.xlu0 %v1553_v19  ;;  %2977 = vpow2.f32 %v1545_v27 }
 0x78a   : > { %v2976_v20 = vpop.eup %2975 }
 0x78b   : > { %v1550_v21 = vsel %vm629_vm3, %v2976_v20, 0.0 }
 0x78c   : > { %1551 = vadd.xlane.f32.xlu1 %v1550_v21 }
 0x792   : > { %v2978_v28 = vpop.eup %2977 }
 0x793   : > { %v1556_v29 = vsel %vm629_vm3, %v2978_v28, 0.0 }
 0x79d   : > { %1815 = vrot.lane.b32.xlu1 %v3417_v22, %s3173_s7 }
 0x79e   : > { %1765 = vrot.lane.b32.xlu0 %v3412_v18, %s3173_s7 }
 0x7a2   : > { %1763 = vrot.lane.b32.xlu0 %v3419_v25, %s3173_s7 }
 0x7a6   : > { %1865 = vrot.lane.b32.xlu0 %v3421_v26, %s3173_s7 }
 0x7aa   : > { %1863 = vrot.lane.b32.xlu0 %v3435_v32, %s3173_s7 }
 0x7c1   : > { %1557 = vadd.xlane.f32.xlu1 %v1556_v29 }
 0x7d2   : > { %1813 = vrot.lane.b32.xlu1 %v3437_v33, %s3173_s7  ;;  %v1673_v33 = vsel %vm681_vm2, %v1668_v30, 0 }
 0x7d6   : > { %1915 = vrot.lane.b32.xlu1 %v3429_v31, %s3173_s7  ;;  %v1716_v31 = vpop.permute.xlu1 %1715 }
 0x7d7   : > { %v1721_v54 = vsel %vm681_vm2, %v1716_v31, 0 }
 0x7da   : > { %1913 = vrot.lane.b32.xlu1 %v3450_v35, %s3173_s7 }
 0x7e0   : > { %v1549_v18 = vpop.xlane.xlu0 %1548 }
 0x7e1   : > { %2979 = vrcp.f32 %v1549_v18 }
 0x7e4   : > { %v1572_v22 = vpop.permute.xlu0 %1571 }
 0x7e5   : > { %v1577_v25 = vsel %vm681_vm2, %v1572_v22, 0 }
 0x7e6   : > { %2739 = vmatpush3.bf16.msra.mxu1 %v1577_v25 }
 0x7e7   : > { %2750 = vmatprep.subr.bf16.mxu1 %v3169_v16 }
 0x7eb   : > { %v2980_v26 = vpop.eup %2979 }
 0x7ec   : > { %v1560_v32 = vmul.f32 %v2980_v26, %v2972_v63 }
 0x7ee   : > { %v1567_v34 = vpack.c.bf16 %v1560_v32, %v1560_v32 }
 0x7f0   : > { %2741 = vmatmul.mubr.msk.bf16.vlgmr.msra.gmra.mrb[40].mxu1 %vm629_vm3, %v1567_v34 }
 0x7f1   : > { %2751 = vmatpush3.bf16.msra.mxu1 %v1673_v33  ;;  %2752 = vmatprep.mubr.msk.bf16.mxu1 %vm3170_vm0, %v3169_v16 }
 0x7f2   : > { %2762 = vmatprep.subr.bf16.mxu1 %v3169_v16 }
 0x815   : > { %v1555_v35 = vpop.xlane.xlu0 %1554 }
 0x816   : > { %2981 = vrcp.f32 %v1555_v35 }
 0x819   : > { %v1552_v42 = vpop.xlane.xlu1 %1551  ;;  %v1766_v43 = vpop.permute.xlu0 %1765 }
 0x81a   : > { %2983 = vrcp.f32 %v1552_v42  ;;  %v1771_v52 = vsel %vm440_vm1, %v1766_v43, 0 }
 0x81d   : > { %v1764_v50 = vpop.permute.xlu0 %1763  ;;  %v1816_v57 = vpop.permute.xlu1 %1815 }
 0x81e   : > { %v1821_v63 = vsel %vm440_vm1, %v1816_v57, 0 }
 0x820   : > { %v2982_v46 = vpop.eup %2981 }
 0x821   : > { %v1564_v47 = vmul.f32 %v2982_v46, %v2974_v17  ;;  %v1866_v38 = vpop.permute.xlu0 %1865 }
 0x822   : > { %v1871_v55 = vsel %vm440_vm1, %v1866_v38, 0 }
 0x823   : > { %v1569_v48 = vpack.c.bf16 %v1564_v47, %v1564_v47 }
 0x824   : > { %v2984_v49 = vpop.eup %2983 }
 0x825   : > { %v1562_v51 = vmul.f32 %v2984_v49, %v2976_v20  ;;  %2753 = vmatmul.mubr.msk.bf16.vlgmr.msra.gmra.mrb[44].mxu1 %vm629_vm3, %v1569_v48  ;;  %v1864_v56 = vpop.permute.xlu0 %1863 }
 0x826   : > { %2763 = vmatpush3.bf16.xpose.msra.mxu1 %v1771_v52  ;;  %2764 = vmatprep.mubr.msk.bf16.mxu1 %vm3170_vm0, %v3169_v16 }
 0x827   : > { %v1568_v53 = vpack.c.bf16 %v1562_v51, %v1562_v51  ;;  %2774 = vmatprep.subr.bf16.mxu1 %v3169_v16 }
 0x829   : > { %2747 = vmatmul.mubr.msk.bf16.vlgmr.msra.gmra.mrb[52].mxu0 %vm629_vm3, %v1568_v53 }
 0x82a   : > { %2757 = vmatpush3.bf16.msra.mxu0 %v1721_v54  ;;  %2758 = vmatprep.mubr.msk.bf16.mxu0 %vm3170_vm0, %v3169_v16 }
 0x82b   : > { %2768 = vmatprep.subr.bf16.mxu0 %v3169_v16 }
 0x82d   : > { %2765 = vmatmul.mubr.msk.bf16.vlgmr.msra.gmra.mrb[48].mxu1 %vm440_vm1, %v1764_v50 }
 0x82e   : > { %2775 = vmatpush3.bf16.xpose.msra.mxu1 %v1871_v55  ;;  %2776 = vmatprep.mubr.msk.bf16.mxu1 %vm3170_vm0, %v3169_v16 }
 0x82f   : > { %2786 = vmatprep.subr.bf16.mxu1 %v3169_v16 }
 0x835   : > { %2777 = vmatmul.mubr.msk.bf16.vlgmr.msra.gmra.mrb[52].mxu1 %vm440_vm1, %v1864_v56 }
 0x836   : > { %2788 = vmatprep.mubr.msk.bf16.mxu1 %vm3170_vm0, %v3169_v16 }
 0x84e   : > { %v1558_v58 = vpop.xlane.xlu1 %1557 }
 0x84f   : > { %2985 = vrcp.f32 %v1558_v58 }
 0x852   : > { %v1814_v62 = vpop.permute.xlu1 %1813 }
 0x856   : > { %v1916_v1 = vpop.permute.xlu1 %1915 }
 0x857   : > { %v1921_v3 = vsel %vm440_vm1, %v1916_v1, 0 }
 0x859   : > { %v2986_v59 = vpop.eup %2985 }
 0x85a   : > { %v1566_v60 = vmul.f32 %v2986_v59, %v2978_v28  ;;  %v1914_v5 = vpop.permute.xlu1 %1913 }
 0x85c   : > { %v1570_v61 = vpack.c.bf16 %v1566_v60, %v1566_v60 }
 0x85e   : > { %2759 = vmatmul.mubr.msk.bf16.vlgmr.msra.gmra.mrb[56].mxu0 %vm629_vm3, %v1570_v61 }
 0x85f   : > { %2769 = vmatpush3.bf16.xpose.msra.mxu0 %v1821_v63  ;;  %2770 = vmatprep.mubr.msk.bf16.mxu0 %vm3170_vm0, %v3169_v16 }
 0x860   : > { %2780 = vmatprep.subr.bf16.mxu0 %v3169_v16 }
 0x866   : > { %2771 = vmatmul.mubr.msk.bf16.vlgmr.msra.gmra.mrb[60].mxu0 %vm440_vm1, %v1814_v62 }
 0x867   : > { %2781 = vmatpush3.bf16.xpose.msra.mxu0 %v1921_v3  ;;  %2782 = vmatprep.mubr.msk.bf16.mxu0 %vm3170_vm0, %v3169_v16 }
 0x868   : > { %2792 = vmatprep.subr.bf16.mxu0 %v3169_v16 }
 0x86e   : > { %2783 = vmatmul.mubr.msk.bf16.vlgmr.msra.gmra.mrb[64].mxu0 %vm440_vm1, %v1914_v5 }
 0x86f   : > { %2794 = vmatprep.mubr.msk.bf16.mxu0 %vm3170_vm0, %v3169_v16 }
 0x8c3   : > { %v1613_v6 = vpop.f32.mrb[40].mxu1 }
 0x8c4   : > { %v2742_v10 = vpop.f32.mrb[41].mxu1 }
 0x8c5   : > { %v1616_v11 = vpop.f32.mrb[42].mxu1 }
 0x8c6   : > { %v2743_v12 = vpop.f32.mrb[43].mxu1 }
 0x8f8   : > { %v3704_v15 = vpop.f32.mrb[44].mxu1 }
 0x8f9   : > { %v2754_v0 = vpop.f32.mrb[45].mxu1 }
 0x8fa   : > { %v1712_v17 = vpop.f32.mrb[46].mxu1 }
 0x8fb   : > { %v2755_v19 = vpop.f32.mrb[47].mxu1 }
 0x8fc   : > { %v1661_v20 = vpop.f32.mrb[52].mxu0 }
 0x8fd   : > { %v2919_v21 = vpack.i.bf16 %v1661_v20, %v1613_v6  ;;  %v2748_v23 = vpop.f32.mrb[53].mxu0 }
 0x8fe   : > { %v1664_v24 = vpop.f32.mrb[54].mxu0 }
 0x8ff   : > { %v2749_v27 = vpop.f32.mrb[55].mxu0 }
 0x900   : > { %v1807_v28 = vpop.f32.mrb[48].mxu1 }
 0x901   : > { %v1963_v29 = vmul.f32 0.17677669, %v1807_v28  ;;  %v2766_v18 = vpop.f32.mrb[49].mxu1 }
 0x902   : > { %v1810_v22 = vpop.f32.mrb[50].mxu1 }
 0x903   : > { %v2767_v25 = vpop.f32.mrb[51].mxu1  ;;  %v1967_v26 = vsel %vm629_vm3, %v1963_v29, -inf }
 0x904   : > { %1968 = vmax.xlane.f32.xlu0 %v1967_v26 }
 0x908   : > { %v1907_v32 = vpop.f32.mrb[52].mxu1 }
 0x909   : > { %v1965_v30 = vmul.f32 0.17677669, %v1907_v32  ;;  %v2778_v34 = vpop.f32.mrb[53].mxu1 }
 0x90a   : > { %v1910_v33 = vpop.f32.mrb[54].mxu1 }
 0x90b   : > { %v2779_v31 = vpop.f32.mrb[55].mxu1  ;;  %v1973_v35 = vsel %vm629_vm3, %v1965_v30, -inf }
 0x90c   : > { %1974 = vmax.xlane.f32.xlu0 %v1973_v35 }
 0x931   : > { %v1757_v42 = vpop.f32.mrb[56].mxu0 }
 0x932   : > { %v2924_v43 = vpack.i.bf16 %v1757_v42, %v3704_v15  ;;  %v2760_v46 = vpop.f32.mrb[57].mxu0 }
 0x933   : > { %v1760_v47 = vpop.f32.mrb[58].mxu0 }
 0x934   : > { %v2761_v48 = vpop.f32.mrb[59].mxu0 }
 0x939   : > { %v1857_v49 = vpop.f32.mrb[60].mxu0 }
 0x93a   : > { %v1964_v50 = vmul.f32 0.17677669, %v1857_v49  ;;  %v2772_v51 = vpop.f32.mrb[61].mxu0 }
 0x93b   : > { %v1860_v52 = vpop.f32.mrb[62].mxu0  ;;  %v2272_v51 = vld [vmem:[#allocation7 + $0x8] sm:$0xff] }
 0x93c   : > { %v2773_v53 = vpop.f32.mrb[63].mxu0  ;;  %v1970_v54 = vsel %vm629_vm3, %v1964_v50, -inf  ;;  %v2273_v52 = vld [vmem:[#allocation7 + $0x10] sm:$0xff] }
 0x93d   : > { %1971 = vmax.xlane.f32.xlu1 %v1970_v54 }
 0x941   : > { %v1957_v38 = vpop.f32.mrb[64].mxu0 }
 0x942   : > { %v1966_v55 = vmul.f32 0.17677669, %v1957_v38  ;;  %v2784_v56 = vpop.f32.mrb[65].mxu0 }
 0x943   : > { %v1960_v57 = vpop.f32.mrb[66].mxu0  ;;  %v2276_v56 = vld [vmem:[#allocation7 + $0x28] sm:$0xff] }
 0x944   : > { %v2785_v58 = vpop.f32.mrb[67].mxu0  ;;  %v1976_v59 = vsel %vm629_vm3, %v1966_v55, -inf }
 0x945   : > { %1977 = vmax.xlane.f32.xlu0 %v1976_v59 }
 0x991   : > { %v1969_v60 = vpop.xlane.xlu0 %1968 }
 0x992   : > { %v1979_v61 = vsub.f32 %v1963_v29, %v1969_v60 }
 0x994   : > { %v1983_v62 = vmul.f32 1.442695, %v1979_v61 }
 0x996   : > { %2987 = vpow2.f32 %v1983_v62 }
 0x999   : > { %v1975_v63 = vpop.xlane.xlu0 %1974 }
 0x99a   : > { %v1981_v1 = vsub.f32 %v1965_v30, %v1975_v63 }
 0x99c   : > { %v1987_v3 = vmul.f32 1.442695, %v1981_v1  ;;  %v2277_v1 = vld [vmem:[#allocation7 + $0x30] sm:$0xff] }
 0x99e   : > { %2989 = vpow2.f32 %v1987_v3  ;;  %v2278_v3 = vld [vmem:[#allocation7 + $0x38] sm:$0xff] }
 0x9a0   : > { %v2988_v5 = vpop.eup %2987 }
 0x9a1   : > { %v1991_v6 = vsel %vm629_vm3, %v2988_v5, 0.0 }
 0x9a2   : > { %1992 = vadd.xlane.f32.xlu0 %v1991_v6 }
 0x9a8   : > { %v2990_v10 = vpop.eup %2989 }
 0x9a9   : > { %v1997_v11 = vsel %vm629_vm3, %v2990_v10, 0.0 }
 0x9aa   : > { %1998 = vadd.xlane.f32.xlu0 %v1997_v11  ;;  %v2279_v11 = vld [vmem:[#allocation7 + $0x40] sm:$0xff] }
 0x9c0   : > { %2015 = vrot.lane.b32.xlu0 %v3460_v40, %s3173_s7 }
 0x9c4   : > { %2910 = vrot.lane.b32.xlu0 %v2909_v14, %s3173_s7 }
 0x9c8   : > { %2920 = vrot.lane.b32.xlu0 %v2919_v21, %s3172_s23 }
 0x9ca   : > { %v1972_v12 = vpop.xlane.xlu1 %1971 }
 0x9cb   : > { %v1980_v15 = vsub.f32 %v1964_v50, %v1972_v12  ;;  %v2271_v50 = vld [vmem:[#allocation7] sm:$0xff]  ;;  %v2280_v12 = vld [vmem:[#allocation7 + $0x48] sm:$0xff] }
 0x9cc   : > { %v2287_v53 = vpack.c.bf16 %v2272_v51, %v2271_v50 }
 0x9cd   : > { %v1985_v0 = vmul.f32 1.442695, %v1980_v15  ;;  %v2291_v15 = vpack.c.bf16 %v2280_v12, %v2279_v11 }
 0x9cf   : > { %2991 = vpow2.f32 %v1985_v0  ;;  %v2281_v0 = vld [vmem:[#allocation7 + $0x50] sm:$0xff] }
 0x9d2   : > { %v1978_v40 = vpop.xlane.xlu0 %1977 }
 0x9d3   : > { %v1982_v20 = vsub.f32 %v1966_v55, %v1978_v40  ;;  %v2275_v55 = vld [vmem:[#allocation7 + $0x20] sm:$0xff] }
 0x9d4   : > { %v2289_v61 = vpack.c.bf16 %v2276_v56, %v2275_v55  ;;  %v2283_v40 = vld [vmem:[#allocation7 + $0x60] sm:$0xff] }
 0x9d5   : > { %v1989_v2 = vmul.f32 1.442695, %v1982_v20  ;;  %v2284_v20 = vld [vmem:[#allocation7 + $0x68] sm:$0xff]  ;;  %v2506_v56 = vld [vmem:[%s3823_s3] ss:$0 sm:$0xff] }
 0x9d7   : > { %2993 = vpow2.f32 %v1989_v2  ;;  %v2293_v2 = vpack.c.bf16 %v2284_v20, %v2283_v40 }
 0x9d9   : > { %v2992_v17 = vpop.eup %2991 }
 0x9da   : > { %v1994_v19 = vsel %vm629_vm3, %v2992_v17, 0.0 }
 0x9db   : > { %1995 = vadd.xlane.f32.xlu1 %v1994_v19 }
 0x9e1   : > { %v2994_v13 = vpop.eup %2993 }
 0x9e2   : > { %v2000_v14 = vsel %vm629_vm3, %v2994_v13, 0.0 }
 0x9ec   : > { %2063 = vrot.lane.b32.xlu1 %v3462_v41, %s3173_s7 }
 0x9f0   : > { %2111 = vrot.lane.b32.xlu1 %v3496_v39, %s3173_s7 }
 0xa14   : > { %2001 = vadd.xlane.f32.xlu1 %v2000_v14  ;;  %v2286_v14 = vld [vmem:[#allocation7 + $0x78] sm:$0xff] }
 0xa25   : > { %2159 = vrot.lane.b32.xlu1 %v3506_v36, %s3173_s7 }
 0xa29   : > { %2915 = vrot.lane.b32.xlu1 %v2914_v45, %s3173_s7 }
 0xa2d   : > { %2925 = vrot.lane.b32.xlu1 %v2924_v43, %s3172_s23 }
 0xa2f   : > { %v1993_v41 = vpop.xlane.xlu0 %1992 }
 0xa30   : > { %2995 = vrcp.f32 %v1993_v41 }
 0xa37   : > { %v1999_v39 = vpop.xlane.xlu0 %1998 }
 0xa38   : > { %2997 = vrcp.f32 %v1999_v39 }
 0xa3a   : > { %v2996_v21 = vpop.eup %2995 }
 0xa3b   : > { %v2004_v23 = vmul.f32 %v2996_v21, %v2988_v5  ;;  %v2016_v24 = vpop.permute.xlu0 %2015 }
 0xa3c   : > { %v2021_v27 = vsel %vm681_vm2, %v2016_v24, 0 }
 0xa3d   : > { %2787 = vmatpush3.bf16.msra.mxu1 %v2021_v27  ;;  %v2011_v28 = vpack.c.bf16 %v2004_v23, %v2004_v23 }
 0xa3e   : > { %2798 = vmatprep.subr.bf16.mxu1 %v3169_v16 }
 0xa40   : > { %2789 = vmatmul.mubr.msk.bf16.vlgmr.msra.gmra.mrb[56].mxu1 %vm629_vm3, %v2011_v28  ;;  %v2911_v28 = vpop.permute.xlu0 %2910 }
 0xa41   : > { %2800 = vmatprep.mubr.msk.bf16.mxu1 %vm3170_vm0, %v3169_v16 }
 0xa42   : > { %v2998_v7 = vpop.eup %2997 }
 0xa43   : > { %v2008_v29 = vmul.f32 %v2998_v7, %v2990_v10  ;;  %v2290_v10 = vpack.c.bf16 %v2278_v3, %v2277_v1  ;;  %v2913_v7 = vunpack.i.h.bf16 %v2911_v28 }
 0xa45   : > { %v2013_v26 = vpack.c.bf16 %v2008_v29, %v2008_v29 }
 0xa68   : > { %v1996_v36 = vpop.xlane.xlu1 %1995 }
 0xa69   : > { %2999 = vrcp.f32 %v1996_v36  ;;  %v2921_v36 = vpop.permute.xlu0 %2920 }
 0xa6a   : > { %v2922_v29 = vunpack.i.l.bf16 %v2921_v36 }
 0xa6c   : > { %v2064_v44 = vpop.permute.xlu1 %2063 }
 0xa6d   : > { %v2069_v45 = vsel %vm681_vm2, %v2064_v44, 0  ;;  %v2912_v44 = vunpack.i.l.bf16 %v2911_v28 }
 0xa6e   : > { %2793 = vmatpush3.bf16.msra.mxu0 %v2069_v45  ;;  %v2923_v45 = vunpack.i.h.bf16 %v2921_v36 }
 0xa6f   : > { %2804 = vmatprep.subr.bf16.mxu0 %v3169_v16 }
 0xa70   : > { %v2112_v18 = vpop.permute.xlu1 %2111 }
 0xa71   : > { %v2117_v22 = vsel %vm681_vm2, %v2112_v18, 0 }
 0xa72   : > { %2799 = vmatpush3.bf16.msra.mxu1 %v2117_v22  ;;  %v2256_v22 = vsel %vm440_vm1, %v3544_v9, %v2913_v7 }
 0xa73   : > { %v3000_v25 = vpop.eup %2999  ;;  %2810 = vmatprep.subr.bf16.mxu1 %v2287_v53 }
 0xa74   : > { %v2006_v32 = vmul.f32 %v3000_v25, %v2992_v17  ;;  %v2282_v17 = vld [vmem:[#allocation7 + $0x58] sm:$0xff]  ;;  %v2255_v25 = vsel %vm440_vm1, %v3540_v4, %v2912_v44 }
 0xa75   : > { %2801 = vmatmul.mubr.msk.bf16.vlgmr.msra.gmra.mrb[60].mxu1 %vm629_vm3, %v2013_v26  ;;  %v2292_v19 = vpack.c.bf16 %v2282_v17, %v2281_v0 }
 0xa76   : > { %v2012_v30 = vpack.c.bf16 %v2006_v32, %v2006_v32  ;;  %2811 = vmatpush3.bf16.msra.mxu1 %v2287_v53 }
 0xa78   : > { %2795 = vmatmul.mubr.msk.bf16.vlgmr.msra.gmra.mrb[68].mxu0 %vm629_vm3, %v2012_v30  ;;  %v2260_v30 = vsel %vm2259_vm4, %v2255_v25, %v2922_v29 }
 0xa79   : > { %2806 = vmatprep.mubr.msk.bf16.mxu0 %vm3170_vm0, %v3169_v16  ;;  %v2274_v16 = vld [vmem:[#allocation7 + $0x18] sm:$0xff] }
 0xa7a   : > { %v2288_v38 = vpack.c.bf16 %v2274_v16, %v2273_v52 }
 0xa7c   : > { %2812 = vmatprep.subr.bf16.mxu1 %v2288_v38 }
 0xa7d   : > { %2813 = vmatpush3.bf16.msra.mxu1 %v2288_v38 }
 0xa7e   : > { %2814 = vmatprep.subr.bf16.mxu1 %v2289_v61 }
 0xa81   : > { %2815 = vmatpush3.bf16.msra.mxu1 %v2289_v61 }
 0xa82   : > { %2816 = vmatprep.subr.bf16.mxu1 %v2290_v10 }
 0xa85   : > { %2817 = vmatpush3.bf16.msra.mxu1 %v2290_v10 }
 0xa86   : > { %2818 = vmatprep.subr.bf16.mxu1 %v2291_v15 }
 0xa89   : > { %2819 = vmatpush3.bf16.msra.mxu1 %v2291_v15 }
 0xa8a   : > { %2820 = vmatprep.subr.bf16.mxu1 %v2292_v19 }
 0xa8d   : > { %2821 = vmatpush3.bf16.msra.mxu1 %v2292_v19 }
 0xa8e   : > { %2822 = vmatprep.subr.bf16.mxu1 %v2293_v2 }
 0xa91   : > { %2823 = vmatpush3.bf16.msra.mxu1 %v2293_v2 }
 0xaa1   : > { %v2002_v34 = vpop.xlane.xlu1 %2001 }
 0xaa2   : > { %3001 = vrcp.f32 %v2002_v34  ;;  %v2261_v34 = vsel %vm2259_vm4, %v2256_v22, %v2923_v45 }
 0xaa5   : > { %v2160_v33 = vpop.permute.xlu1 %2159 }
 0xaa6   : > { %v2165_v31 = vsel %vm681_vm2, %v2160_v33, 0 }
 0xaa7   : > { %2805 = vmatpush3.bf16.msra.mxu0 %v2165_v31 }
 0xaac   : > { %v3002_v35 = vpop.eup %3001 }
 0xaad   : > { %v2010_v42 = vmul.f32 %v3002_v35, %v2994_v13  ;;  %v2285_v13 = vld [vmem:[#allocation7 + $0x70] sm:$0xff] }
 0xaae   : > { %v2294_v41 = vpack.c.bf16 %v2286_v14, %v2285_v13 }
 0xaaf   : > { %v2014_v43 = vpack.c.bf16 %v2010_v42, %v2010_v42  ;;  %v2916_v42 = vpop.permute.xlu1 %2915 }
 0xab0   : > { %2824 = vmatprep.subr.bf16.mxu1 %v2294_v41  ;;  %v2917_v9 = vunpack.i.l.bf16 %v2916_v42 }
 0xab1   : > { %2807 = vmatmul.mubr.msk.bf16.vlgmr.msra.gmra.mrb[72].mxu0 %vm629_vm3, %v2014_v43  ;;  %2825 = vmatpush3.bf16.msra.mxu1 %v2294_v41 }
 0xab2   : > { %v2257_v50 = vsel %vm440_vm1, %v3542_v8, %v2917_v9 }
 0xab3   : > { %v2926_v43 = vpop.permute.xlu1 %2925 }
 0xb13   : > { %v2057_v46 = vpop.f32.mrb[56].mxu1 }
 0xb14   : > { %v2790_v47 = vpop.f32.mrb[57].mxu1 }
 0xb15   : > { %v2060_v48 = vpop.f32.mrb[58].mxu1  ;;  %v2928_v47 = vunpack.i.h.bf16 %v2926_v43 }
 0xb16   : > { %v2791_v49 = vpop.f32.mrb[59].mxu1  ;;  %v2927_v48 = vunpack.i.l.bf16 %v2926_v43 }
 0xb18   : > { %v2262_v53 = vsel %vm2259_vm4, %v2257_v50, %v2927_v48 }
 0xb48   : > { %v2153_v54 = vpop.f32.mrb[60].mxu1 }
 0xb49   : > { %v2802_v57 = vpop.f32.mrb[61].mxu1 }
 0xb4a   : > { %v2156_v58 = vpop.f32.mrb[62].mxu1 }
 0xb4b   : > { %v2105_v59 = vpop.f32.mrb[68].mxu0  ;;  %v2803_v60 = vpop.f32.mrb[63].mxu1 }
 0xb4c   : > { %v2929_v62 = vpack.i.bf16 %v2105_v59, %v2057_v46  ;;  %v2796_v63 = vpop.f32.mrb[69].mxu0  ;;  %v2918_v46 = vunpack.i.h.bf16 %v2916_v42 }
 0xb4d   : > { %v2108_v5 = vpop.f32.mrb[70].mxu0 }
 0xb4e   : > { %2930 = vrot.lane.b32.xlu0 %v2929_v62, %s3171_s21  ;;  %v2797_v6 = vpop.f32.mrb[71].mxu0  ;;  %v2258_v49 = vsel %vm440_vm1, %v3548_v37, %v2918_v46 }
 0xb4f   : > { %v2263_v16 = vsel %vm2259_vm4, %v2258_v49, %v2928_v47 }
 0xb84   : > { %v2201_v39 = vpop.f32.mrb[72].mxu0 }
 0xb85   : > { %v2934_v21 = vpack.i.bf16 %v2201_v39, %v2153_v54  ;;  %v2808_v23 = vpop.f32.mrb[73].mxu0 }
 0xb86   : > { %v2204_v24 = vpop.f32.mrb[74].mxu0 }
 0xb87   : > { %2935 = vrot.lane.b32.xlu1 %v2934_v21, %s3171_s21  ;;  %v2809_v27 = vpop.f32.mrb[75].mxu0 }
 0xbc0   : > { %v2931_v18 = vpop.permute.xlu0 %2930 }
 0xbc1   : > { %v2933_v26 = vunpack.i.h.bf16 %v2931_v18  ;;  %v2932_v32 = vunpack.i.l.bf16 %v2931_v18 }
 0xbc3   : > { %v2265_v33 = vsel %vm2264_vm5, %v2260_v30, %v2932_v32  ;;  %v2266_v31 = vsel %vm2264_vm5, %v2261_v34, %v2933_v26 }
 0xbc4   : > { %v2269_v35 = vpack.c.bf16 %v2266_v31, %v2265_v33 }
 0xbc6   : > { %2826 = vmatprep.mubr.bf16.mxu1 %v2269_v35 }
 0xbf9   : > { %v2936_v4 = vpop.permute.xlu1 %2935 }
 0xbfa   : > { %v2938_v51 = vunpack.i.h.bf16 %v2936_v4  ;;  %v2937_v52 = vunpack.i.l.bf16 %v2936_v4 }
 0xbfc   : > { %v2268_v54 = vsel %vm2264_vm5, %v2263_v16, %v2938_v51  ;;  %v2267_v38 = vsel %vm2264_vm5, %v2262_v53, %v2937_v52 }
 0xbfd   : > { %v2270_v55 = vpack.c.bf16 %v2268_v54, %v2267_v38 }
 0xbff   : > { %2827 = vmatmul.mubr.bf16.vlgmr.msra.gmra.mrb[64].mxu1 %v2270_v55 }
 0xcd2   : > { %v2828_v8 = vpop.f32.mrb[64].mxu1 }
 0xcd3   : > { %v2345_v37 = vadd.f32 %v2828_v8, %v2506_v56  ;;  %v2336_v57 = vpop.f32.mrb[65].mxu1 }
 0xcd4   : > { %v2337_v58 = vadd.f32 %v2506_v56, %v2336_v57  ;;  %v2829_v59 = vpop.f32.mrb[66].mxu1 }
 0xcd5   : > { %2353 = vst [vmem:[%s244_s6 + $0x10] sm:$0xff] %v2345_v37  ;;  %v2348_v60 = vadd.f32 %v2829_v59, %v2506_v56  ;;  %v2339_v61 = vpop.f32.mrb[67].mxu1 }
 0xcd6   : > { %2351 = vst [vmem:[%s244_s6] sm:$0xff] %v2337_v58  ;;  %v2340_v62 = vadd.f32 %v2506_v56, %v2339_v61 }
 0xcd7   : > { %2354 = vst [vmem:[%s244_s6 + $0x18] sm:$0xff] %v2348_v60 }
 0xcd8   : > { %2352 = vst [vmem:[%s244_s6 + $0x8] sm:$0xff] %v2340_v62 }
 0xcd9   : > { %3102 = shalt.err (!%p3099_p2)
}
 0xcda   : > { %s3103_s25 = scalar_lea.hbm %s3776_s29, 512  ;;  %s3107_s7 = scalar_lea.hbm %s3824_s4, 1024 }
 0xcdb   : > { %p3104_p13 = scmp.ne.s32.totalorder %s3776_s29, %s3103_s25  ;;  %p3108_p4 = scmp.lt.u32.totalorder %s3776_s29, %s3824_s4 }
 0xcdc   : > { %p3109_p7 = scmp.lt.u32.totalorder %s3107_s7, %s3103_s25  ;;  %p3111_p11 = scmp.lt.u32.totalorder %s3103_s25, %s3776_s29 }
 0xcdd   : > { %p3105_p6 = pnand %p3104_p13, %p3838_p0 }
 0xcde   : > { %p3110_p8 = por %p3109_p7, %p3108_p4 }
 0xcdf   : > { %p3106_p10 = pneg %p3105_p6 }
 0xce0   : > { %p3112_p1 = por %p3111_p11, %p3110_p8 }
 0xce2   : > { %p3113_p3 = pnand %p3112_p1, %p3106_p10 }
 0xce4   : > { %3116 = shalt.err (!%p3113_p3)
}
 0xce5   : > { %s3175_s6 = smov 128   ;;  %s3176_s28 = smov 8  }
 0xce6   : > { %2840 = dma.vmem_to_hbm [thread:$0]  (%p3838_p0), %s3771_s9, 512, %s3776_s29, %s2356_s19, %s3175_s6, %s3175_s6, %s3176_s28  }
 0xce7 PF: > { %s2384_s27 = sand.u32 1, %s3147_s15   ;;  %p3839_p5 = scmp.ne.s32.totalorder %s3829_s22, 0 }
 0xce8   : > { %p3840_p9 = scmp.ge.s32.totalorder %s3159_s18, 2  ;;  %s2385_s20 = scalar_lea.sflag [#allocation4], %s2384_s27 }
 0xcea   : > { %p2854_p12 = pnand %p3840_p9, %p3839_p5 }
 0xcec   : > { %3142 = dma.done.wait (!%p2854_p12), %s2385_s20, 512  }
 0xced   : > { %3144 = vsyncadd (!%p2854_p12), %s2385_s20, 4294966784  ;;  %p18_p2 = scmp.ge.s32.totalorder %s3315_s11, 4   ;;  %s3841_s15 = smov %s3151_s16 }
 0xcee   : > { %s3842_s16 = smov %s3155_s17  ;;  %s3843_s17 = smov %s3324_s14 }
 0xcef   : > { %s3844_s18 = smov %s3315_s11  ;;  %20 = sbr.rel (!%p18_p2) target bundleno = 6 (0x6), region = 89 }
 0xcf6   :  { %2390 = vsyncpa [#allocation3], 1 }
 0xcf7   :  { %2392 = vsyncpa [#allocation3 + $0x1], 1 }
 0xcf8   :  { %2393 = vsyncpa [#allocation6], 1 }
 0xcf9   :  { %2394 = vsyncpa [#allocation4], 1 }
 0xcfa   :  { %2396 = vsyncpa [#allocation4 + $0x1], 1 }

</bundles_post_ra>
